<compile_context>
chip_gen: v7x
topology: tpu7x:2x2x1
jax: 0.10.0
libtpu: 0.0.40
codegen_flags: <defaults>
</compile_context>

<pallas_src>
import jax
import jax.numpy as jnp
import numpy as np
from jax import lax
from jax.experimental import pallas as pl
from jax.experimental.pallas import tpu as pltpu  # noqa: F401  (TPU backend assumed)

# ----- model hyper-parameters (small, consistent with the module signature) -----
B, S, D_IN = 2, 8, 16          # batch, seq_length, input_dim
E, H, FFN, L = 32, 4, 64, 2    # embed_dim, num_heads, ffn_hidden_dim, num_layers
NUM_CLASSES = 5                # classifier head exists in __init__ but is unused
FEAT = 21                      # feature_layer output dim
OUT_PAD = 128                  # lane-dense padded output width (sliced back to FEAT)
HD = E // H                    # head dim
EPS = 1e-5                     # nn.LayerNorm default eps
N = B * S                      # flattened token count
NK = H * N                     # head-expanded key axis
SLAB_W = 128                   # parameter-slab lane width

# ------------------- parameter-slab layout (static offsets) -------------------
_OFF = {}


def _build_layout():
    off = 0

    def alloc(name, rows):
        nonlocal off
        _OFF[name] = off
        off += ((rows + 7) // 8) * 8          # keep every block 8-row aligned

    alloc("w_emb", D_IN)        # (D_IN, E)
    alloc("emb_bias", N)        # (N, E)   pos-enc tiled over batch + b_emb
    alloc("sbmask", N)          # (N, NK)  1 iff key column is in the same batch
    alloc("kmask", E)           # (E, NK)  block-diagonal head selector for keys
    alloc("vmask", NK)          # (NK, E)  block-diagonal head selector for values
    alloc("sumblk", NK)         # (NK, NK) block-ones: per-head chunk sums
    alloc("pavg", 8)            # (8, N)   mean-pool matrix (rows >= B are zero)
    alloc("wfeat", E)           # (E, OUT_PAD)
    alloc("bfeat", 1)           # (1, OUT_PAD)
    for l in range(L):
        alloc(f"wqkv{l}", E)    # (E, 3E)  (Q columns pre-scaled by 1/sqrt(HD))
        alloc(f"wout{l}", E)    # (E, E)
        alloc(f"w1{l}", E)      # (E, FFN)
        alloc(f"w2{l}", FFN)    # (FFN, E)
        alloc(f"bias{l}", 8)    # 8 rows: bqkv, bout, ln1g, ln1b, b1, b2, ln2g, ln2b
    return off


SLAB_ROWS = _build_layout()

# advisory cost estimate (matmul MACs * 2, exp/recip/rsqrt counts, bytes moved)
_MACS = (N * D_IN * E
         + L * N * (E * 3 * E + E * NK + NK * NK + NK * E + E * E + E * FFN + FFN * E)
         + 8 * N * E + 8 * E * OUT_PAD)
_COST = pl.CostEstimate(
    flops=2 * _MACS,
    transcendentals=L * 2 * N * NK + 4 * N,
    bytes_accessed=4 * (N * D_IN + N + SLAB_ROWS * SLAB_W + 8 * OUT_PAD))


def _layernorm(x, g, b):
    mu = jnp.mean(x, axis=-1, keepdims=True)
    var = jnp.mean((x - mu) ** 2, axis=-1, keepdims=True)
    return (x - mu) * lax.rsqrt(var + EPS) * g + b


# --------------------------------- kernel ---------------------------------
def transformer_kernel(x_ref, mask_ref, slab_ref, out_ref):
    def blk(name, rows, cols):
        return slab_ref[pl.ds(_OFF[name], rows), pl.ds(0, cols)]

    x = x_ref[...]                                              # (N, D_IN)

    # additive attention bias, built ONCE: 0 where (same batch AND key valid),
    # -1e30 otherwise (finite -> no NaN even if a row had no valid keys).
    key_ok = jnp.concatenate([mask_ref[...]] * H, axis=1)       # (1, NK), 0/1
    attn_bias = (blk("sbmask", N, NK) * key_ok - 1.0) * jnp.float32(1e30)  # (N, NK)

    # loop-invariant constant selectors
    kmask = blk("kmask", E, NK)
    vmask = blk("vmask", NK, E)
    sumblk = blk("sumblk", NK, NK)

    # embedding + (pre-fused positional encoding + embedding bias)
    h = jnp.dot(x, blk("w_emb", D_IN, E), preferred_element_type=jnp.float32)
    h = h + blk("emb_bias", N, E)                               # (N, E)

    for l in range(L):                                          # static unrolled
        bias8 = blk(f"bias{l}", 8, SLAB_W)                      # per-layer vectors

        # fused QKV projection (1/sqrt(HD) already folded into the Q part)
        qkv = jnp.dot(h, blk(f"wqkv{l}", E, 3 * E),
                      preferred_element_type=jnp.float32) + bias8[0:1, 0:3 * E]
        q = qkv[:, 0:E]
        k = qkv[:, E:2 * E]
        v = qkv[:, 2 * E:3 * E]

        # ---- all heads in ONE scores matmul (block-diagonal key expansion) ----
        ktil = jnp.concatenate([k.T] * H, axis=1) * kmask       # (E, NK)
        scores = jnp.dot(q, ktil, preferred_element_type=jnp.float32) + attn_bias
        m = jnp.max(scores, axis=-1, keepdims=True)             # row max (>= every chunk)
        p = jnp.exp(scores - m)                                 # masked entries -> 0
        denom = jnp.dot(p, sumblk, preferred_element_type=jnp.float32)  # per-head sums
        p = p * pl.reciprocal(denom, approx=True)
        vtil = jnp.concatenate([v] * H, axis=0) * vmask         # (NK, E)
        ctx = jnp.dot(p, vtil, preferred_element_type=jnp.float32)      # (N, E) heads concat
        attn = jnp.dot(ctx, blk(f"wout{l}", E, E),
                       preferred_element_type=jnp.float32) + bias8[1:2, 0:E]

        # residual + LayerNorm 1
        h = _layernorm(h + attn, bias8[2:3, 0:E], bias8[3:4, 0:E])

        # FFN: Linear -> ReLU -> Linear
        f = jnp.maximum(
            jnp.dot(h, blk(f"w1{l}", E, FFN),
                    preferred_element_type=jnp.float32) + bias8[4:5, 0:FFN], 0.0)
        f = jnp.dot(f, blk(f"w2{l}", FFN, E),
                    preferred_element_type=jnp.float32) + bias8[5:6, 0:E]

        # residual + LayerNorm 2
        h = _layernorm(h + f, bias8[6:7, 0:E], bias8[7:8, 0:E])

    # mean over the sequence axis as a tiny matmul (includes padded positions,
    # matching AdaptiveAvgPool1d semantics), then the feature layer.
    pooled = jnp.dot(blk("pavg", 8, N), h, preferred_element_type=jnp.float32)  # (8, E)
    out_ref[...] = jnp.dot(pooled, blk("wfeat", E, OUT_PAD),
                           preferred_element_type=jnp.float32) + blk("bfeat", 1, OUT_PAD)


# --------------------------------- wrapper ---------------------------------
@jax.jit
def transformer_classifier_2(x, masks, slab):
    """x: (B,S,D_IN) f32, masks: (B,S) f32 (1=valid). Returns (B, FEAT)."""
    x2 = x.reshape(N, D_IN).astype(jnp.float32)
    mask2 = masks.reshape(1, N).astype(jnp.float32)
    out = pl.pallas_call(
        transformer_kernel,
        out_shape=jax.ShapeDtypeStruct((8, OUT_PAD), jnp.float32),
        cost_estimate=_COST,
    )(x2, mask2, slab)
    return out[:B, :FEAT]


# ------------------------- parameter construction -------------------------
def make_positional_encoding(seq_length, embed_dim):
    position = jnp.arange(seq_length, dtype=jnp.float32)[:, None]             # (S,1)
    div_term = jnp.exp(jnp.arange(0, embed_dim, 2, dtype=jnp.float32)
                       * (-jnp.log(10000.0) / embed_dim))                     # (E/2,)
    sin = jnp.sin(position * div_term)
    cos = jnp.cos(position * div_term)
    return jnp.stack([sin, cos], axis=-1).reshape(seq_length, embed_dim)      # interleave


def init_params(key):
    ks = jax.random.split(key, 16)
    sc = 0.05
    p = {
        "pos":   make_positional_encoding(S, E),
        "w_emb": sc * jax.random.normal(ks[0], (D_IN, E), jnp.float32),
        "b_emb": sc * jax.random.normal(ks[1], (E,), jnp.float32),
        "wqkv":  sc * jax.random.normal(ks[2], (L, E, 3 * E), jnp.float32),
        "bqkv":  sc * jax.random.normal(ks[3], (L, 3 * E), jnp.float32),
        "wout":  sc * jax.random.normal(ks[4], (L, E, E), jnp.float32),
        "bout":  sc * jax.random.normal(ks[5], (L, E), jnp.float32),
        "ln1g":  jnp.ones((L, E), jnp.float32),
        "ln1b":  jnp.zeros((L, E), jnp.float32),
        "w1":    sc * jax.random.normal(ks[6], (L, E, FFN), jnp.float32),
        "b1":    sc * jax.random.normal(ks[7], (L, FFN), jnp.float32),
        "w2":    sc * jax.random.normal(ks[8], (L, FFN, E), jnp.float32),
        "b2":    sc * jax.random.normal(ks[9], (L, E), jnp.float32),
        "ln2g":  jnp.ones((L, E), jnp.float32),
        "ln2b":  jnp.zeros((L, E), jnp.float32),
        "wfeat": sc * jax.random.normal(ks[10], (E, FEAT), jnp.float32),
        "bfeat": sc * jax.random.normal(ks[11], (FEAT,), jnp.float32),
    }
    # TODO(synk): self.classifier (Linear(21, num_classes)) is defined in __init__
    # but never used in forward(), so it is intentionally omitted here.
    return p


def pack_params(p):
    """Pack all parameters + constant selector matrices into ONE f32 slab."""
    slab = np.zeros((SLAB_ROWS, SLAB_W), np.float32)

    def put(name, arr):
        arr = np.asarray(arr, np.float32)
        r, c = arr.shape
        slab[_OFF[name]:_OFF[name] + r, :c] = arr

    put("w_emb", p["w_emb"])
    put("emb_bias", np.tile(np.asarray(p["pos"]), (B, 1)) + np.asarray(p["b_emb"])[None, :])

    sbmask = np.zeros((N, NK), np.float32)             # same-batch key mask
    for nq in range(N):
        for c in range(NK):
            if (nq // S) == ((c % N) // S):
                sbmask[nq, c] = 1.0
    put("sbmask", sbmask)

    kmask = np.zeros((E, NK), np.float32)              # head block selectors
    for hh in range(H):
        kmask[hh * HD:(hh + 1) * HD, hh * N:(hh + 1) * N] = 1.0
    put("kmask", kmask)
    put("vmask", kmask.T)

    sumblk = np.zeros((NK, NK), np.float32)            # per-head chunk-sum matrix
    for hh in range(H):
        sumblk[hh * N:(hh + 1) * N, hh * N:(hh + 1) * N] = 1.0
    put("sumblk", sumblk)

    pavg = np.zeros((8, N), np.float32)                # mean-pool matrix
    for b in range(B):
        pavg[b, b * S:(b + 1) * S] = 1.0 / S
    put("pavg", pavg)

    wfeat = np.zeros((E, OUT_PAD), np.float32)
    wfeat[:, :FEAT] = np.asarray(p["wfeat"])
    put("wfeat", wfeat)
    bfeat = np.zeros((1, OUT_PAD), np.float32)
    bfeat[0, :FEAT] = np.asarray(p["bfeat"])
    put("bfeat", bfeat)

    scale = 1.0 / np.sqrt(HD)
    for l in range(L):
        wqkv = np.asarray(p["wqkv"][l]).copy()
        wqkv[:, :E] *= scale                            # fold 1/sqrt(HD) into Q
        put(f"wqkv{l}", wqkv)
        put(f"wout{l}", p["wout"][l])
        put(f"w1{l}", p["w1"][l])
        put(f"w2{l}", p["w2"][l])

        bias = np.zeros((8, SLAB_W), np.float32)
        bqkv = np.asarray(p["bqkv"][l]).copy()
        bqkv[:E] *= scale
        bias[0, :3 * E] = bqkv
        bias[1, :E] = np.asarray(p["bout"][l])
        bias[2, :E] = np.asarray(p["ln1g"][l])
        bias[3, :E] = np.asarray(p["ln1b"][l])
        bias[4, :FFN] = np.asarray(p["b1"][l])
        bias[5, :E] = np.asarray(p["b2"][l])
        bias[6, :E] = np.asarray(p["ln2g"][l])
        bias[7, :E] = np.asarray(p["ln2b"][l])
        put(f"bias{l}", bias)

    return jnp.asarray(slab)


# ------------------------- pure-JAX reference -------------------------
def reference_forward(x, masks, p):
    h = x @ p["w_emb"] + p["b_emb"] + p["pos"][None]                       # (B,S,E)
    scale = 1.0 / np.sqrt(HD)
    key_mask = masks[:, None, :] > 0.5                                     # (B,1,S)
    for l in range(L):
        qkv = h @ p["wqkv"][l] + p["bqkv"][l]
        q, k, v = qkv[..., :E], qkv[..., E:2 * E], qkv[..., 2 * E:]
        heads = []
        for hh in range(H):
            qh = q[..., hh * HD:(hh + 1) * HD]
            kh = k[..., hh * HD:(hh + 1) * HD]
            vh = v[..., hh * HD:(hh + 1) * HD]
            sc_ = jnp.einsum("bqd,bkd->bqk", qh, kh) * scale
            sc_ = jnp.where(key_mask, sc_, -jnp.inf)
            pr = jax.nn.softmax(sc_, axis=-1)
            heads.append(jnp.einsum("bqk,bkd->bqd", pr, vh))
        attn = jnp.concatenate(heads, axis=-1) @ p["wout"][l] + p["bout"][l]
        h = _layernorm(h + attn, p["ln1g"][l], p["ln1b"][l])
        f = jnp.maximum(h @ p["w1"][l] + p["b1"][l], 0.0) @ p["w2"][l] + p["b2"][l]
        h = _layernorm(h + f, p["ln2g"][l], p["ln2b"][l])
    pooled = jnp.mean(h, axis=1)                                           # (B,E)
    return pooled @ p["wfeat"] + p["bfeat"]                                # (B,FEAT)


if __name__ == "__main__":
    key = jax.random.PRNGKey(0)
    k_x, k_p = jax.random.split(key)
    x = jax.random.normal(k_x, (B, S, D_IN), jnp.float32)
    # masks: 1 = valid, 0 = padded (last 2 positions of each sequence padded)
    masks = jnp.concatenate(
        [jnp.ones((B, S - 2), jnp.float32), jnp.zeros((B, 2), jnp.float32)], axis=1)

    params = init_params(k_p)
    slab = pack_params(params)           # built ONCE at init, not per call

    out = transformer_classifier_2(x, masks, slab)
    out = jax.block_until_ready(out)

    ref = jax.block_until_ready(reference_forward(x, masks, params))

    assert out.shape == (B, FEAT)
    assert np.all(np.isfinite(np.asarray(out)))
    np.testing.assert_allclose(np.asarray(out), np.asarray(ref), rtol=5e-3, atol=5e-3)
    print("KERNEL_OK")
</pallas_src>

<mosaic_0001>
module attributes {stable_mosaic.version = 11 : i64} {
  func.func @transformer_kernel(%arg0: memref<16x16xf32, #tpu.memory_space<vmem>>, %arg1: memref<1x16xf32, #tpu.memory_space<vmem>>, %arg2: memref<592x128xf32, #tpu.memory_space<vmem>>, %arg3: memref<8x128xf32, #tpu.memory_space<vmem>>) attributes {dimension_semantics = [], scalar_prefetch = 0 : i64, scratch_operands = 0 : i64, tpu.core_type = #tpu.core_type<tc>} {
    %c0 = arith.constant 0 : index
    %c0_0 = arith.constant 0 : index
    %0 = vector.load %arg0[%c0, %c0_0] : memref<16x16xf32, #tpu.memory_space<vmem>>, vector<16x16xf32>
    %c0_1 = arith.constant 0 : index
    %c0_2 = arith.constant 0 : index
    %1 = vector.load %arg1[%c0_1, %c0_2] : memref<1x16xf32, #tpu.memory_space<vmem>>, vector<1x16xf32>
    %2 = tpu.concatenate %1, %1, %1, %1 in 1 : vector<1x16xf32>, vector<1x16xf32>, vector<1x16xf32>, vector<1x16xf32> -> vector<1x64xf32>
    %c32 = arith.constant 32 : index
    %c0_3 = arith.constant 0 : index
    %3 = vector.load %arg2[%c32, %c0_3] : memref<592x128xf32, #tpu.memory_space<vmem>>, vector<16x64xf32>
    %4 = vector.broadcast %2 : vector<1x64xf32> to vector<16x64xf32>
    %5 = arith.mulf %3, %4 : vector<16x64xf32>
    %cst = arith.constant 1.000000e+00 : f32
    %6 = vector.broadcast %cst : f32 to vector<16x64xf32>
    %7 = arith.subf %5, %6 : vector<16x64xf32>
    %cst_4 = arith.constant 1.000000e+30 : f32
    %8 = vector.broadcast %cst_4 : f32 to vector<16x64xf32>
    %9 = arith.mulf %7, %8 : vector<16x64xf32>
    %c48 = arith.constant 48 : index
    %c0_5 = arith.constant 0 : index
    %10 = vector.load %arg2[%c48, %c0_5] : memref<592x128xf32, #tpu.memory_space<vmem>>, vector<32x64xf32>
    %c80 = arith.constant 80 : index
    %c0_6 = arith.constant 0 : index
    %11 = vector.load %arg2[%c80, %c0_6] : memref<592x128xf32, #tpu.memory_space<vmem>>, vector<64x32xf32>
    %c144 = arith.constant 144 : index
    %c0_7 = arith.constant 0 : index
    %12 = vector.load %arg2[%c144, %c0_7] : memref<592x128xf32, #tpu.memory_space<vmem>>, vector<64x64xf32>
    %c0_8 = arith.constant 0 : index
    %c0_9 = arith.constant 0 : index
    %13 = vector.load %arg2[%c0_8, %c0_9] : memref<592x128xf32, #tpu.memory_space<vmem>>, vector<16x32xf32>
    %cst_10 = arith.constant dense<0.000000e+00> : vector<16x32xf32>
    %14 = tpu.matmul %0, %13, %cst_10 {dimension_numbers = #tpu.dot_dimension_numbers<[1], [0], [0], [1], [0, 0, 1, 1], [], []>} : vector<16x16xf32>, vector<16x32xf32>, vector<16x32xf32> -> vector<16x32xf32>
    %c16 = arith.constant 16 : index
    %c0_11 = arith.constant 0 : index
    %15 = vector.load %arg2[%c16, %c0_11] : memref<592x128xf32, #tpu.memory_space<vmem>>, vector<16x32xf32>
    %16 = arith.addf %14, %15 : vector<16x32xf32>
    %c416 = arith.constant 416 : index
    %c0_12 = arith.constant 0 : index
    %17 = vector.load %arg2[%c416, %c0_12] : memref<592x128xf32, #tpu.memory_space<vmem>>, vector<8x128xf32>
    %c256 = arith.constant 256 : index
    %c0_13 = arith.constant 0 : index
    %18 = vector.load %arg2[%c256, %c0_13] : memref<592x128xf32, #tpu.memory_space<vmem>>, vector<32x96xf32>
    %cst_14 = arith.constant dense<0.000000e+00> : vector<16x96xf32>
    %19 = tpu.matmul %16, %18, %cst_14 {dimension_numbers = #tpu.dot_dimension_numbers<[1], [0], [0], [1], [0, 0, 1, 1], [], []>} : vector<16x32xf32>, vector<32x96xf32>, vector<16x96xf32> -> vector<16x96xf32>
    %20 = vector.extract_strided_slice %17 {offsets = [0, 0], sizes = [1, 96], strides = [1, 1]} : vector<8x128xf32> to vector<1x96xf32>
    %21 = vector.broadcast %20 : vector<1x96xf32> to vector<16x96xf32>
    %22 = arith.addf %19, %21 : vector<16x96xf32>
    %23 = vector.extract_strided_slice %22 {offsets = [0, 0], sizes = [16, 32], strides = [1, 1]} : vector<16x96xf32> to vector<16x32xf32>
    %24 = vector.extract_strided_slice %22 {offsets = [0, 32], sizes = [16, 32], strides = [1, 1]} : vector<16x96xf32> to vector<16x32xf32>
    %25 = vector.extract_strided_slice %22 {offsets = [0, 64], sizes = [16, 32], strides = [1, 1]} : vector<16x96xf32> to vector<16x32xf32>
    %26 = tpu.transpose %24, [1, 0] : vector<16x32xf32> -> vector<32x16xf32>
    %27 = tpu.concatenate %26, %26, %26, %26 in 1 : vector<32x16xf32>, vector<32x16xf32>, vector<32x16xf32>, vector<32x16xf32> -> vector<32x64xf32>
    %28 = arith.mulf %27, %10 : vector<32x64xf32>
    %cst_15 = arith.constant dense<0.000000e+00> : vector<16x64xf32>
    %29 = tpu.matmul %23, %28, %cst_15 {dimension_numbers = #tpu.dot_dimension_numbers<[1], [0], [0], [1], [0, 0, 1, 1], [], []>} : vector<16x32xf32>, vector<32x64xf32>, vector<16x64xf32> -> vector<16x64xf32>
    %30 = arith.addf %29, %9 : vector<16x64xf32>
    %cst_16 = arith.constant dense<0xFF800000> : vector<16xf32>
    %31 = vector.multi_reduction <maximumf>, %30, %cst_16 [1] : vector<16x64xf32> to vector<16xf32>
    %32 = vector.shape_cast %31 : vector<16xf32> to vector<16x1xf32>
    %33 = vector.broadcast %32 : vector<16x1xf32> to vector<16x64xf32>
    %34 = arith.subf %30, %33 : vector<16x64xf32>
    %35 = math.exp %34 : vector<16x64xf32>
    %cst_17 = arith.constant dense<0.000000e+00> : vector<16x64xf32>
    %36 = tpu.matmul %35, %12, %cst_17 {dimension_numbers = #tpu.dot_dimension_numbers<[1], [0], [0], [1], [0, 0, 1, 1], [], []>} : vector<16x64xf32>, vector<64x64xf32>, vector<16x64xf32> -> vector<16x64xf32>
    %37 = tpu.reciprocal %36 {approx = true} : vector<16x64xf32> -> vector<16x64xf32>
    %38 = arith.mulf %35, %37 : vector<16x64xf32>
    %39 = tpu.concatenate %25, %25, %25, %25 in 0 : vector<16x32xf32>, vector<16x32xf32>, vector<16x32xf32>, vector<16x32xf32> -> vector<64x32xf32>
    %40 = arith.mulf %39, %11 : vector<64x32xf32>
    %cst_18 = arith.constant dense<0.000000e+00> : vector<16x32xf32>
    %41 = tpu.matmul %38, %40, %cst_18 {dimension_numbers = #tpu.dot_dimension_numbers<[1], [0], [0], [1], [0, 0, 1, 1], [], []>} : vector<16x64xf32>, vector<64x32xf32>, vector<16x32xf32> -> vector<16x32xf32>
    %c288 = arith.constant 288 : index
    %c0_19 = arith.constant 0 : index
    %42 = vector.load %arg2[%c288, %c0_19] : memref<592x128xf32, #tpu.memory_space<vmem>>, vector<32x32xf32>
    %cst_20 = arith.constant dense<0.000000e+00> : vector<16x32xf32>
    %43 = tpu.matmul %41, %42, %cst_20 {dimension_numbers = #tpu.dot_dimension_numbers<[1], [0], [0], [1], [0, 0, 1, 1], [], []>} : vector<16x32xf32>, vector<32x32xf32>, vector<16x32xf32> -> vector<16x32xf32>
    %44 = vector.extract_strided_slice %17 {offsets = [1, 0], sizes = [1, 32], strides = [1, 1]} : vector<8x128xf32> to vector<1x32xf32>
    %45 = vector.broadcast %44 : vector<1x32xf32> to vector<16x32xf32>
    %46 = arith.addf %43, %45 : vector<16x32xf32>
    %47 = arith.addf %16, %46 : vector<16x32xf32>
    %48 = vector.extract_strided_slice %17 {offsets = [2, 0], sizes = [1, 32], strides = [1, 1]} : vector<8x128xf32> to vector<1x32xf32>
    %49 = vector.extract_strided_slice %17 {offsets = [3, 0], sizes = [1, 32], strides = [1, 1]} : vector<8x128xf32> to vector<1x32xf32>
    %cst_21 = arith.constant dense<0.000000e+00> : vector<16xf32>
    %50 = vector.multi_reduction <add>, %47, %cst_21 [1] : vector<16x32xf32> to vector<16xf32>
    %51 = vector.shape_cast %50 : vector<16xf32> to vector<16x1xf32>
    %cst_22 = arith.constant 3.200000e+01 : f32
    %52 = vector.broadcast %cst_22 : f32 to vector<16x1xf32>
    %53 = arith.divf %51, %52 : vector<16x1xf32>
    %54 = vector.broadcast %53 : vector<16x1xf32> to vector<16x32xf32>
    %55 = arith.subf %47, %54 : vector<16x32xf32>
    %56 = arith.mulf %55, %55 : vector<16x32xf32>
    %cst_23 = arith.constant dense<0.000000e+00> : vector<16xf32>
    %57 = vector.multi_reduction <add>, %56, %cst_23 [1] : vector<16x32xf32> to vector<16xf32>
    %58 = vector.shape_cast %57 : vector<16xf32> to vector<16x1xf32>
    %cst_24 = arith.constant 3.200000e+01 : f32
    %59 = vector.broadcast %cst_24 : f32 to vector<16x1xf32>
    %60 = arith.divf %58, %59 : vector<16x1xf32>
    %61 = vector.broadcast %53 : vector<16x1xf32> to vector<16x32xf32>
    %62 = arith.subf %47, %61 : vector<16x32xf32>
    %cst_25 = arith.constant 9.99999974E-6 : f32
    %63 = vector.broadcast %cst_25 : f32 to vector<16x1xf32>
    %64 = arith.addf %60, %63 : vector<16x1xf32>
    %65 = math.rsqrt %64 : vector<16x1xf32>
    %66 = vector.broadcast %65 : vector<16x1xf32> to vector<16x32xf32>
    %67 = arith.mulf %62, %66 : vector<16x32xf32>
    %68 = vector.broadcast %48 : vector<1x32xf32> to vector<16x32xf32>
    %69 = arith.mulf %67, %68 : vector<16x32xf32>
    %70 = vector.broadcast %49 : vector<1x32xf32> to vector<16x32xf32>
    %71 = arith.addf %69, %70 : vector<16x32xf32>
    %c320 = arith.constant 320 : index
    %c0_26 = arith.constant 0 : index
    %72 = vector.load %arg2[%c320, %c0_26] : memref<592x128xf32, #tpu.memory_space<vmem>>, vector<32x64xf32>
    %cst_27 = arith.constant dense<0.000000e+00> : vector<16x64xf32>
    %73 = tpu.matmul %71, %72, %cst_27 {dimension_numbers = #tpu.dot_dimension_numbers<[1], [0], [0], [1], [0, 0, 1, 1], [], []>} : vector<16x32xf32>, vector<32x64xf32>, vector<16x64xf32> -> vector<16x64xf32>
    %74 = vector.extract_strided_slice %17 {offsets = [4, 0], sizes = [1, 64], strides = [1, 1]} : vector<8x128xf32> to vector<1x64xf32>
    %75 = vector.broadcast %74 : vector<1x64xf32> to vector<16x64xf32>
    %76 = arith.addf %73, %75 : vector<16x64xf32>
    %cst_28 = arith.constant 0.000000e+00 : f32
    %77 = vector.broadcast %cst_28 : f32 to vector<16x64xf32>
    %78 = arith.maximumf %76, %77 : vector<16x64xf32>
    %c352 = arith.constant 352 : index
    %c0_29 = arith.constant 0 : index
    %79 = vector.load %arg2[%c352, %c0_29] : memref<592x128xf32, #tpu.memory_space<vmem>>, vector<64x32xf32>
    %cst_30 = arith.constant dense<0.000000e+00> : vector<16x32xf32>
    %80 = tpu.matmul %78, %79, %cst_30 {dimension_numbers = #tpu.dot_dimension_numbers<[1], [0], [0], [1], [0, 0, 1, 1], [], []>} : vector<16x64xf32>, vector<64x32xf32>, vector<16x32xf32> -> vector<16x32xf32>
    %81 = vector.extract_strided_slice %17 {offsets = [5, 0], sizes = [1, 32], strides = [1, 1]} : vector<8x128xf32> to vector<1x32xf32>
    %82 = vector.broadcast %81 : vector<1x32xf32> to vector<16x32xf32>
    %83 = arith.addf %80, %82 : vector<16x32xf32>
    %84 = arith.addf %71, %83 : vector<16x32xf32>
    %85 = vector.extract_strided_slice %17 {offsets = [6, 0], sizes = [1, 32], strides = [1, 1]} : vector<8x128xf32> to vector<1x32xf32>
    %86 = vector.extract_strided_slice %17 {offsets = [7, 0], sizes = [1, 32], strides = [1, 1]} : vector<8x128xf32> to vector<1x32xf32>
    %cst_31 = arith.constant dense<0.000000e+00> : vector<16xf32>
    %87 = vector.multi_reduction <add>, %84, %cst_31 [1] : vector<16x32xf32> to vector<16xf32>
    %88 = vector.shape_cast %87 : vector<16xf32> to vector<16x1xf32>
    %cst_32 = arith.constant 3.200000e+01 : f32
    %89 = vector.broadcast %cst_32 : f32 to vector<16x1xf32>
    %90 = arith.divf %88, %89 : vector<16x1xf32>
    %91 = vector.broadcast %90 : vector<16x1xf32> to vector<16x32xf32>
    %92 = arith.subf %84, %91 : vector<16x32xf32>
    %93 = arith.mulf %92, %92 : vector<16x32xf32>
    %cst_33 = arith.constant dense<0.000000e+00> : vector<16xf32>
    %94 = vector.multi_reduction <add>, %93, %cst_33 [1] : vector<16x32xf32> to vector<16xf32>
    %95 = vector.shape_cast %94 : vector<16xf32> to vector<16x1xf32>
    %cst_34 = arith.constant 3.200000e+01 : f32
    %96 = vector.broadcast %cst_34 : f32 to vector<16x1xf32>
    %97 = arith.divf %95, %96 : vector<16x1xf32>
    %98 = vector.broadcast %90 : vector<16x1xf32> to vector<16x32xf32>
    %99 = arith.subf %84, %98 : vector<16x32xf32>
    %cst_35 = arith.constant 9.99999974E-6 : f32
    %100 = vector.broadcast %cst_35 : f32 to vector<16x1xf32>
    %101 = arith.addf %97, %100 : vector<16x1xf32>
    %102 = math.rsqrt %101 : vector<16x1xf32>
    %103 = vector.broadcast %102 : vector<16x1xf32> to vector<16x32xf32>
    %104 = arith.mulf %99, %103 : vector<16x32xf32>
    %105 = vector.broadcast %85 : vector<1x32xf32> to vector<16x32xf32>
    %106 = arith.mulf %104, %105 : vector<16x32xf32>
    %107 = vector.broadcast %86 : vector<1x32xf32> to vector<16x32xf32>
    %108 = arith.addf %106, %107 : vector<16x32xf32>
    %c584 = arith.constant 584 : index
    %c0_36 = arith.constant 0 : index
    %109 = vector.load %arg2[%c584, %c0_36] : memref<592x128xf32, #tpu.memory_space<vmem>>, vector<8x128xf32>
    %c424 = arith.constant 424 : index
    %c0_37 = arith.constant 0 : index
    %110 = vector.load %arg2[%c424, %c0_37] : memref<592x128xf32, #tpu.memory_space<vmem>>, vector<32x96xf32>
    %cst_38 = arith.constant dense<0.000000e+00> : vector<16x96xf32>
    %111 = tpu.matmul %108, %110, %cst_38 {dimension_numbers = #tpu.dot_dimension_numbers<[1], [0], [0], [1], [0, 0, 1, 1], [], []>} : vector<16x32xf32>, vector<32x96xf32>, vector<16x96xf32> -> vector<16x96xf32>
    %112 = vector.extract_strided_slice %109 {offsets = [0, 0], sizes = [1, 96], strides = [1, 1]} : vector<8x128xf32> to vector<1x96xf32>
    %113 = vector.broadcast %112 : vector<1x96xf32> to vector<16x96xf32>
    %114 = arith.addf %111, %113 : vector<16x96xf32>
    %115 = vector.extract_strided_slice %114 {offsets = [0, 0], sizes = [16, 32], strides = [1, 1]} : vector<16x96xf32> to vector<16x32xf32>
    %116 = vector.extract_strided_slice %114 {offsets = [0, 32], sizes = [16, 32], strides = [1, 1]} : vector<16x96xf32> to vector<16x32xf32>
    %117 = vector.extract_strided_slice %114 {offsets = [0, 64], sizes = [16, 32], strides = [1, 1]} : vector<16x96xf32> to vector<16x32xf32>
    %118 = tpu.transpose %116, [1, 0] : vector<16x32xf32> -> vector<32x16xf32>
    %119 = tpu.concatenate %118, %118, %118, %118 in 1 : vector<32x16xf32>, vector<32x16xf32>, vector<32x16xf32>, vector<32x16xf32> -> vector<32x64xf32>
    %120 = arith.mulf %119, %10 : vector<32x64xf32>
    %cst_39 = arith.constant dense<0.000000e+00> : vector<16x64xf32>
    %121 = tpu.matmul %115, %120, %cst_39 {dimension_numbers = #tpu.dot_dimension_numbers<[1], [0], [0], [1], [0, 0, 1, 1], [], []>} : vector<16x32xf32>, vector<32x64xf32>, vector<16x64xf32> -> vector<16x64xf32>
    %122 = arith.addf %121, %9 : vector<16x64xf32>
    %cst_40 = arith.constant dense<0xFF800000> : vector<16xf32>
    %123 = vector.multi_reduction <maximumf>, %122, %cst_40 [1] : vector<16x64xf32> to vector<16xf32>
    %124 = vector.shape_cast %123 : vector<16xf32> to vector<16x1xf32>
    %125 = vector.broadcast %124 : vector<16x1xf32> to vector<16x64xf32>
    %126 = arith.subf %122, %125 : vector<16x64xf32>
    %127 = math.exp %126 : vector<16x64xf32>
    %cst_41 = arith.constant dense<0.000000e+00> : vector<16x64xf32>
    %128 = tpu.matmul %127, %12, %cst_41 {dimension_numbers = #tpu.dot_dimension_numbers<[1], [0], [0], [1], [0, 0, 1, 1], [], []>} : vector<16x64xf32>, vector<64x64xf32>, vector<16x64xf32> -> vector<16x64xf32>
    %129 = tpu.reciprocal %128 {approx = true} : vector<16x64xf32> -> vector<16x64xf32>
    %130 = arith.mulf %127, %129 : vector<16x64xf32>
    %131 = tpu.concatenate %117, %117, %117, %117 in 0 : vector<16x32xf32>, vector<16x32xf32>, vector<16x32xf32>, vector<16x32xf32> -> vector<64x32xf32>
    %132 = arith.mulf %131, %11 : vector<64x32xf32>
    %cst_42 = arith.constant dense<0.000000e+00> : vector<16x32xf32>
    %133 = tpu.matmul %130, %132, %cst_42 {dimension_numbers = #tpu.dot_dimension_numbers<[1], [0], [0], [1], [0, 0, 1, 1], [], []>} : vector<16x64xf32>, vector<64x32xf32>, vector<16x32xf32> -> vector<16x32xf32>
    %c456 = arith.constant 456 : index
    %c0_43 = arith.constant 0 : index
    %134 = vector.load %arg2[%c456, %c0_43] : memref<592x128xf32, #tpu.memory_space<vmem>>, vector<32x32xf32>
    %cst_44 = arith.constant dense<0.000000e+00> : vector<16x32xf32>
    %135 = tpu.matmul %133, %134, %cst_44 {dimension_numbers = #tpu.dot_dimension_numbers<[1], [0], [0], [1], [0, 0, 1, 1], [], []>} : vector<16x32xf32>, vector<32x32xf32>, vector<16x32xf32> -> vector<16x32xf32>
    %136 = vector.extract_strided_slice %109 {offsets = [1, 0], sizes = [1, 32], strides = [1, 1]} : vector<8x128xf32> to vector<1x32xf32>
    %137 = vector.broadcast %136 : vector<1x32xf32> to vector<16x32xf32>
    %138 = arith.addf %135, %137 : vector<16x32xf32>
    %139 = arith.addf %108, %138 : vector<16x32xf32>
    %140 = vector.extract_strided_slice %109 {offsets = [2, 0], sizes = [1, 32], strides = [1, 1]} : vector<8x128xf32> to vector<1x32xf32>
    %141 = vector.extract_strided_slice %109 {offsets = [3, 0], sizes = [1, 32], strides = [1, 1]} : vector<8x128xf32> to vector<1x32xf32>
    %cst_45 = arith.constant dense<0.000000e+00> : vector<16xf32>
    %142 = vector.multi_reduction <add>, %139, %cst_45 [1] : vector<16x32xf32> to vector<16xf32>
    %143 = vector.shape_cast %142 : vector<16xf32> to vector<16x1xf32>
    %cst_46 = arith.constant 3.200000e+01 : f32
    %144 = vector.broadcast %cst_46 : f32 to vector<16x1xf32>
    %145 = arith.divf %143, %144 : vector<16x1xf32>
    %146 = vector.broadcast %145 : vector<16x1xf32> to vector<16x32xf32>
    %147 = arith.subf %139, %146 : vector<16x32xf32>
    %148 = arith.mulf %147, %147 : vector<16x32xf32>
    %cst_47 = arith.constant dense<0.000000e+00> : vector<16xf32>
    %149 = vector.multi_reduction <add>, %148, %cst_47 [1] : vector<16x32xf32> to vector<16xf32>
    %150 = vector.shape_cast %149 : vector<16xf32> to vector<16x1xf32>
    %cst_48 = arith.constant 3.200000e+01 : f32
    %151 = vector.broadcast %cst_48 : f32 to vector<16x1xf32>
    %152 = arith.divf %150, %151 : vector<16x1xf32>
    %153 = vector.broadcast %145 : vector<16x1xf32> to vector<16x32xf32>
    %154 = arith.subf %139, %153 : vector<16x32xf32>
    %cst_49 = arith.constant 9.99999974E-6 : f32
    %155 = vector.broadcast %cst_49 : f32 to vector<16x1xf32>
    %156 = arith.addf %152, %155 : vector<16x1xf32>
    %157 = math.rsqrt %156 : vector<16x1xf32>
    %158 = vector.broadcast %157 : vector<16x1xf32> to vector<16x32xf32>
    %159 = arith.mulf %154, %158 : vector<16x32xf32>
    %160 = vector.broadcast %140 : vector<1x32xf32> to vector<16x32xf32>
    %161 = arith.mulf %159, %160 : vector<16x32xf32>
    %162 = vector.broadcast %141 : vector<1x32xf32> to vector<16x32xf32>
    %163 = arith.addf %161, %162 : vector<16x32xf32>
    %c488 = arith.constant 488 : index
    %c0_50 = arith.constant 0 : index
    %164 = vector.load %arg2[%c488, %c0_50] : memref<592x128xf32, #tpu.memory_space<vmem>>, vector<32x64xf32>
    %cst_51 = arith.constant dense<0.000000e+00> : vector<16x64xf32>
    %165 = tpu.matmul %163, %164, %cst_51 {dimension_numbers = #tpu.dot_dimension_numbers<[1], [0], [0], [1], [0, 0, 1, 1], [], []>} : vector<16x32xf32>, vector<32x64xf32>, vector<16x64xf32> -> vector<16x64xf32>
    %166 = vector.extract_strided_slice %109 {offsets = [4, 0], sizes = [1, 64], strides = [1, 1]} : vector<8x128xf32> to vector<1x64xf32>
    %167 = vector.broadcast %166 : vector<1x64xf32> to vector<16x64xf32>
    %168 = arith.addf %165, %167 : vector<16x64xf32>
    %cst_52 = arith.constant 0.000000e+00 : f32
    %169 = vector.broadcast %cst_52 : f32 to vector<16x64xf32>
    %170 = arith.maximumf %168, %169 : vector<16x64xf32>
    %c520 = arith.constant 520 : index
    %c0_53 = arith.constant 0 : index
    %171 = vector.load %arg2[%c520, %c0_53] : memref<592x128xf32, #tpu.memory_space<vmem>>, vector<64x32xf32>
    %cst_54 = arith.constant dense<0.000000e+00> : vector<16x32xf32>
    %172 = tpu.matmul %170, %171, %cst_54 {dimension_numbers = #tpu.dot_dimension_numbers<[1], [0], [0], [1], [0, 0, 1, 1], [], []>} : vector<16x64xf32>, vector<64x32xf32>, vector<16x32xf32> -> vector<16x32xf32>
    %173 = vector.extract_strided_slice %109 {offsets = [5, 0], sizes = [1, 32], strides = [1, 1]} : vector<8x128xf32> to vector<1x32xf32>
    %174 = vector.broadcast %173 : vector<1x32xf32> to vector<16x32xf32>
    %175 = arith.addf %172, %174 : vector<16x32xf32>
    %176 = arith.addf %163, %175 : vector<16x32xf32>
    %177 = vector.extract_strided_slice %109 {offsets = [6, 0], sizes = [1, 32], strides = [1, 1]} : vector<8x128xf32> to vector<1x32xf32>
    %178 = vector.extract_strided_slice %109 {offsets = [7, 0], sizes = [1, 32], strides = [1, 1]} : vector<8x128xf32> to vector<1x32xf32>
    %cst_55 = arith.constant dense<0.000000e+00> : vector<16xf32>
    %179 = vector.multi_reduction <add>, %176, %cst_55 [1] : vector<16x32xf32> to vector<16xf32>
    %180 = vector.shape_cast %179 : vector<16xf32> to vector<16x1xf32>
    %cst_56 = arith.constant 3.200000e+01 : f32
    %181 = vector.broadcast %cst_56 : f32 to vector<16x1xf32>
    %182 = arith.divf %180, %181 : vector<16x1xf32>
    %183 = vector.broadcast %182 : vector<16x1xf32> to vector<16x32xf32>
    %184 = arith.subf %176, %183 : vector<16x32xf32>
    %185 = arith.mulf %184, %184 : vector<16x32xf32>
    %cst_57 = arith.constant dense<0.000000e+00> : vector<16xf32>
    %186 = vector.multi_reduction <add>, %185, %cst_57 [1] : vector<16x32xf32> to vector<16xf32>
    %187 = vector.shape_cast %186 : vector<16xf32> to vector<16x1xf32>
    %cst_58 = arith.constant 3.200000e+01 : f32
    %188 = vector.broadcast %cst_58 : f32 to vector<16x1xf32>
    %189 = arith.divf %187, %188 : vector<16x1xf32>
    %190 = vector.broadcast %182 : vector<16x1xf32> to vector<16x32xf32>
    %191 = arith.subf %176, %190 : vector<16x32xf32>
    %cst_59 = arith.constant 9.99999974E-6 : f32
    %192 = vector.broadcast %cst_59 : f32 to vector<16x1xf32>
    %193 = arith.addf %189, %192 : vector<16x1xf32>
    %194 = math.rsqrt %193 : vector<16x1xf32>
    %195 = vector.broadcast %194 : vector<16x1xf32> to vector<16x32xf32>
    %196 = arith.mulf %191, %195 : vector<16x32xf32>
    %197 = vector.broadcast %177 : vector<1x32xf32> to vector<16x32xf32>
    %198 = arith.mulf %196, %197 : vector<16x32xf32>
    %199 = vector.broadcast %178 : vector<1x32xf32> to vector<16x32xf32>
    %200 = arith.addf %198, %199 : vector<16x32xf32>
    %c208 = arith.constant 208 : index
    %c0_60 = arith.constant 0 : index
    %201 = vector.load %arg2[%c208, %c0_60] : memref<592x128xf32, #tpu.memory_space<vmem>>, vector<8x16xf32>
    %cst_61 = arith.constant dense<0.000000e+00> : vector<8x32xf32>
    %202 = tpu.matmul %201, %200, %cst_61 {dimension_numbers = #tpu.dot_dimension_numbers<[1], [0], [0], [1], [0, 0, 1, 1], [], []>} : vector<8x16xf32>, vector<16x32xf32>, vector<8x32xf32> -> vector<8x32xf32>
    %c216 = arith.constant 216 : index
    %c0_62 = arith.constant 0 : index
    %203 = vector.load %arg2[%c216, %c0_62] : memref<592x128xf32, #tpu.memory_space<vmem>>, vector<32x128xf32>
    %cst_63 = arith.constant dense<0.000000e+00> : vector<8x128xf32>
    %204 = tpu.matmul %202, %203, %cst_63 {dimension_numbers = #tpu.dot_dimension_numbers<[1], [0], [0], [1], [0, 0, 1, 1], [], []>} : vector<8x32xf32>, vector<32x128xf32>, vector<8x128xf32> -> vector<8x128xf32>
    %c248 = arith.constant 248 : index
    %c0_64 = arith.constant 0 : index
    %205 = vector.load %arg2[%c248, %c0_64] : memref<592x128xf32, #tpu.memory_space<vmem>>, vector<1x128xf32>
    %206 = vector.broadcast %205 : vector<1x128xf32> to vector<8x128xf32>
    %207 = arith.addf %204, %206 : vector<8x128xf32>
    %c0_65 = arith.constant 0 : index
    %c0_66 = arith.constant 0 : index
    %208 = vector.load %arg3[%c0_65, %c0_66] : memref<8x128xf32, #tpu.memory_space<vmem>>, vector<8x128xf32>
    tpu.vector_store %arg3[%c0_65, %c0_66], %207 {strides = array<i32>} : memref<8x128xf32, #tpu.memory_space<vmem>>, vector<8x128xf32>,
    return
  }
}

</mosaic_0001>

<bundles_post_ra>
// kernel: transformer_classifier_2.1
= control target key start
LH: loop header
LB: loop body
LE: loop exit
PB: predicated region body
PF: predicated region fallthrough
CT: control target
= control target key end

     0   :  { %8 = vsyncpa [#allocation3], 0  ;;  %s3120_s0 = inlined_call_operand.hbm [shape: f32[16,16], index: 0, kind: input, shape index: {}]   ;;  %s3121_s1 = inlined_call_operand.vmem [shape: f32[1,16], index: 1, kind: input, shape index: {}]   ;;  %s3122_s2 = inlined_call_operand.hbm [shape: f32[592,128], index: 2, kind: input, shape index: {}]   ;;  %s3123_s3 = inlined_call_operand.vmem [shape: f32[8,128], index: 3, kind: output, shape index: {}]  }
   0x1   :  { %9 = vsyncpa [#allocation5], 0  ;;  %s2738_s12 = smov [#allocation2]   ;;  %s2690_s16 = scalar_lea.hbm %s3120_s0, 256 }
   0x2   :  { %s15_s13 = sshll.u32 %s2738_s12, 4  ;;  %p2691_p0 = scmp.ne.s32.totalorder %s3120_s0, %s2690_s16  ;;  %s16_s13 = int_to_ptr.vmem [resolvable:$true] %s15_s13 }
   0x3   :  { %p2694_p1 = scmp.lt.u32.totalorder %s2690_s16, %s3120_s0 }
   0x5   :  { %p2696_p2 = pnand %p2694_p1, %p2691_p0 }
   0x7   :  { %2699 = shalt.err (!%p2696_p2)
}
   0x8   :  { %s2700_s21 = scalar_lea.vmem %s16_s13, 256  ;;  %p2705_p4 = scmp.lt.s32.totalorder %s16_s13, %s16_s13 }
   0x9   :  { %p2701_p3 = scmp.ne.s32.totalorder %s16_s13, %s2700_s21  ;;  %p2706_p5 = scmp.lt.s32.totalorder %s2700_s21, %s2700_s21 }
   0xb   :  { %p2707_p6 = por %p2706_p5, %p2705_p4 }
   0xd   :  { %p2708_p7 = pnand %p2707_p6, %p2701_p3 }
   0xf   :  { %2711 = shalt.err (!%p2708_p7)
}
  0x10   :  { %s2739_s22 = smov 128   ;;  %s2740_s23 = smov 8  }
  0x11   :  { %21 = dma.hbm_to_vmem [thread:$0]  %s3120_s0, 256, %s16_s13, [#allocation3], %s2739_s22, %s2739_s22, %s2740_s23  }
  0x12   :  { %s2741_s26 = smov [#allocation4]   ;;  %s2712_s30 = scalar_lea.hbm %s3122_s2, 9472 }
  0x13   :  { %s29_s27 = sshll.u32 %s2741_s26, 4  ;;  %p2713_p8 = scmp.ne.s32.totalorder %s3122_s2, %s2712_s30  ;;  %s30_s27 = int_to_ptr.vmem [resolvable:$true] %s29_s27 }
  0x14   :  { %p2716_p9 = scmp.lt.u32.totalorder %s2712_s30, %s3122_s2 }
  0x16   :  { %p2718_p10 = pnand %p2716_p9, %p2713_p8 }
  0x18   :  { %2721 = shalt.err (!%p2718_p10)
}
  0x19   :  { %s2722_s8 = scalar_lea.vmem %s30_s27, 9472  ;;  %p2727_p12 = scmp.lt.s32.totalorder %s30_s27, %s30_s27 }
  0x1a   :  { %p2723_p11 = scmp.ne.s32.totalorder %s30_s27, %s2722_s8  ;;  %p2728_p13 = scmp.lt.s32.totalorder %s2722_s8, %s2722_s8 }
  0x1c   :  { %p2729_p0 = por %p2728_p13, %p2727_p12 }
  0x1e   :  { %p2730_p1 = pnand %p2729_p0, %p2723_p11 }
  0x20   :  { %2733 = shalt.err (!%p2730_p1)
}
  0x21   :  { %35 = dma.hbm_to_vmem [thread:$0]  %s3122_s2, 9472, %s30_s27, [#allocation5], %s2739_s22, %s2739_s22, %s2740_s23  }
  0x22   :  { %2734 = dma.done.wait [#allocation3], 256  }
  0x23   :  { %2735 = vsyncadd [#allocation3], 4294967040 }
  0x24   :  { %2736 = dma.done.wait [#allocation5], 9472  }
  0x25   :  { %2737 = vsyncadd [#allocation5], 4294957824  ;;  %vm59_vm0 = vcmask 130048   ;;  %v97_v0 = vld [vmem:[#allocation4] sm:$0xff]  ;;  %v98_v1 = vld [vmem:[#allocation4 + $0x8] sm:$0xff]  ;;  %vm61_vm1 = vcmask 261120   ;;  %v46_v17 = vlaneseq }
  0x26   :  { %v42_v2 = vld [vmem:[#allocation2] sm:$0xff]  ;;  %v2433_v3 = vpack.c.bf16 %v98_v1, %v97_v0  ;;  %v183_v4 = vld [vmem:[#allocation4 + $0x100] sm:$0xff]  ;;  %v184_v5 = vld [vmem:[#allocation4 + $0x108] sm:$0xff]  ;;  %s2742_s2 = smov 96   ;;  %s2743_s10 = smov 16   ;;  %vm63_vm2 = vcmask 392192  }
  0x27   :  { %2210 = vmatprep.mubr.msk.f32.mxu0 %vm59_vm0, %v42_v2  ;;  %v2437_v6 = vpack.c.bf16 %v184_v5, %v183_v4  ;;  %v43_v7 = vld [vmem:[#allocation2 + $0x8] sm:$0xff]  ;;  %v185_v8 = vld [vmem:[#allocation4 + $0x110] sm:$0xff]  ;;  %v2804_v18 = vshrl.u32 %v46_v17, 7  ;;  %v2809_v20 = vld [vmem:[#allocation4 + $0x1a0] sm:$0xff]  ;;  %s2744_s11 = smov 32   ;;  %s2745_s12 = smov 48  }
  0x28   :  { %2434 = vmatprep.subr.bf16.mxu0 %v2433_v3  ;;  %v186_v9 = vld [vmem:[#allocation4 + $0x118] sm:$0xff]  ;;  %v99_v11 = vld [vmem:[#allocation4 + $0x10] sm:$0xff]  ;;  %v2857_v59 = vld [vmem:[#allocation4 + $0x48] sm:$0xff]  ;;  %vm447_vm3 = vcmask 523264   ;;  %vm2748_vm4 = vmmov 0  }
  0x29   :  { %2436 = vmatpush3.bf16.msra.mxu0 %v2433_v3  ;;  %2438 = vmatprep.subr.bf16.mxu1 %v2437_v6  ;;  %v2441_v10 = vpack.c.bf16 %v186_v9, %v185_v8  ;;  %v100_v12 = vld [vmem:[#allocation4 + $0x18] sm:$0xff]  ;;  %v2807_v19 = vsub.s32 0, %v2804_v18  ;;  %v44_v32 = vld [vmem:[%s3121_s1] sm:$0x1]  ;;  %v2860_v61 = vld [vmem:[#allocation4 + $0x40] sm:$0xff]  ;;  %s2746_s1 = smov 64  }
  0x2a   :  { %2440 = vmatpush3.bf16.msra.mxu1 %v2437_v6  ;;  %v2845_v42 = vld [vmem:[#allocation4 + $0x30] sm:$0xff]  ;;  %v2848_v44 = vld [vmem:[#allocation4 + $0x38] sm:$0xff] }
  0x2b   :  { %2442 = vmatprep.subr.bf16.mxu1 %v2441_v10  ;;  %v190_v21 = vrot.slane %v2809_v20, %v2807_v19  ;;  %v49_v33 = vrot.slane %v44_v32, %v2807_v19 }
  0x2c   :  { %2211 = vmatmul.mubr.msk.f32.vlgmr.msra.gmra.mrb[0].mxu0 %vm59_vm0, %v43_v7 }
  0x2e   :  { %2444 = vmatpush3.bf16.msra.mxu1 %v2441_v10 }
  0xff   :  { %v2212_v13 = vpop.f32.mrb[0].mxu0 }
 0x100   :  { %v173_v14 = vpop.f32.mrb[1].mxu0  ;;  %v2798_v16 = vadd.f32 %v2212_v13, %v100_v12  ;;  %v65_v13 = vld [vmem:[#allocation4 + $0x20] sm:$0xff] }
 0x101   :  { %v2796_v15 = vadd.f32 %v173_v14, %v99_v11  ;;  %v66_v11 = vld [vmem:[#allocation4 + $0x28] sm:$0xff] }
 0x103   :  { %2221 = vmatprep.mubr.msk.f32.mxu1 %vm61_vm1, %v2796_v15 }
 0x104   :  { %2222 = vmatmul.mubr.msk.f32.vlgmr.msra.gmra.mrb[0].mxu1 %vm61_vm1, %v2798_v16 }
 0x1d7   :  { %v2223_v22 = vpop.f32.mrb[0].mxu1 }
 0x1d8   :  { %v263_v23 = vpop.f32.mrb[1].mxu1  ;;  %v2819_v25 = vadd.f32 %v2223_v22, %v190_v21 }
 0x1d9   :  { %v2813_v24 = vadd.f32 %v263_v23, %v190_v21 }
 0x1db   :  { %274 = vrot.lane.b32.xlu0 %v2813_v24, %s2742_s2  ;;  %2232 = vmatprep.mubr.msk.f32.mxu0 %vm61_vm1, %v2813_v24 }
 0x1df   :  { %276 = vrot.lane.b32.xlu0 %v2819_v25, %s2742_s2 }
 0x24d   :  { %v275_v26 = vpop.permute.xlu0 %274 }
 0x24e   :  { %280 = vxpose.xlu1.b32.start [1/2] (short) (narrow) %v275_v26, 32 }
 0x251   :  { %v277_v27 = vpop.permute.xlu0 %276 }
 0x252   :  { %281 = vxpose.xlu1.b32.end [2/2] (short) (narrow) %v277_v27, 32 }
 0x2ce   :  { %v296_v28 = vpop.trf.xlu1 }
 0x2cf   :  { %316 = vrot.lane.b32.xlu0 %v296_v28, %s2743_s10 }
 0x2d2   :  { %v297_v29 = vpop.trf.xlu1 }
 0x2d3   :  { %328 = vrot.lane.b32.xlu0 %v296_v28, %s2744_s11  ;;  %318 = vrot.lane.b32.xlu1 %v297_v29, %s2743_s10 }
 0x2d6   :  { %v298_v30 = vpop.trf.xlu1 }
 0x2d7   :  { %340 = vrot.lane.b32.xlu0 %v296_v28, %s2745_s12 }
 0x2da   :  { %v299_v31 = vpop.trf.xlu1 }
 0x2db   :  { %330 = vrot.lane.b32.xlu0 %v297_v29, %s2744_s11  ;;  %346 = vrot.lane.b32.xlu1 %v299_v31, %s2745_s12 }
 0x2df   :  { %342 = vrot.lane.b32.xlu0 %v297_v29, %s2745_s12  ;;  %53 = vrot.lane.b32.xlu1 %v49_v33, %s2744_s11 }
 0x2e3   :  { %320 = vrot.lane.b32.xlu0 %v298_v30, %s2743_s10 }
 0x2e7   :  { %332 = vrot.lane.b32.xlu0 %v298_v30, %s2744_s11 }
 0x2eb   :  { %322 = vrot.lane.b32.xlu0 %v299_v31, %s2743_s10 }
 0x2ef   :  { %334 = vrot.lane.b32.xlu0 %v299_v31, %s2744_s11 }
 0x2f3   :  { %344 = vrot.lane.b32.xlu0 %v298_v30, %s2745_s12 }
 0x2f7   :  { %50 = vrot.lane.b32.xlu0 %v49_v33, %s2743_s10 }
 0x2fb   :  { %56 = vrot.lane.b32.xlu0 %v49_v33, %s2745_s12  ;;  %v90_v33 = vld [vmem:[#allocation4 + $0x98] sm:$0xff] }
 0x341   :  { %v317_v34 = vpop.permute.xlu0 %316 }
 0x342   :  { %v352_v39 = vsel %vm59_vm0, %v296_v28, %v317_v34 }
 0x345   :  { %v329_v35 = vpop.permute.xlu0 %328  ;;  %v319_v37 = vpop.permute.xlu1 %318 }
 0x346   :  { %v356_v40 = vsel %vm61_vm1, %v352_v39, %v329_v35  ;;  %v353_v41 = vsel %vm59_vm0, %v297_v29, %v319_v37  ;;  %v82_v35 = vld [vmem:[#allocation4 + $0x58] sm:$0xff]  ;;  %v92_v37 = vld [vmem:[#allocation4 + $0xa8] sm:$0xff]  ;;  %v81_v39 = vld [vmem:[#allocation4 + $0x50] sm:$0xff] }
 0x349   :  { %v341_v36 = vpop.permute.xlu0 %340 }
 0x34a   :  { %v360_v43 = vsel %vm63_vm2, %v356_v40, %v341_v36  ;;  %v91_v36 = vld [vmem:[#allocation4 + $0xa0] sm:$0xff] }
 0x34b   :  { %v364_v48 = vmul.f32 %v360_v43, %v2845_v42  ;;  %v83_v40 = vld [vmem:[#allocation4 + $0x60] sm:$0xff]  ;;  %v94_v43 = vld [vmem:[#allocation4 + $0xb8] sm:$0xff] }
 0x34d   :  { %v331_v38 = vpop.permute.xlu0 %330  ;;  %v347_v57 = vpop.permute.xlu1 %346 }
 0x34e   :  { %v357_v45 = vsel %vm61_vm1, %v353_v41, %v331_v38  ;;  %v2884_v38 = vpack.c.bf16 %v92_v37, %v91_v36  ;;  %v93_v41 = vld [vmem:[#allocation4 + $0xb0] sm:$0xff] }
 0x351   :  { %v343_v46 = vpop.permute.xlu0 %342  ;;  %v54_v6 = vpop.permute.xlu1 %53 }
 0x352   :  { %v361_v47 = vsel %vm63_vm2, %v357_v45, %v343_v46  ;;  %v2889_v45 = vpack.c.bf16 %v94_v43, %v93_v41  ;;  %v84_v46 = vld [vmem:[#allocation4 + $0x68] sm:$0xff] }
 0x353   :  { %v365_v49 = vmul.f32 %v361_v47, %v2848_v44  ;;  %v85_v47 = vld [vmem:[#allocation4 + $0x70] sm:$0xff] }
 0x355   :  { %v321_v50 = vpop.permute.xlu0 %320  ;;  %v2445_v51 = vpack.c.bf16 %v365_v49, %v364_v48  ;;  %v95_v48 = vld [vmem:[#allocation4 + $0xc0] sm:$0xff]  ;;  %v96_v49 = vld [vmem:[#allocation4 + $0xc8] sm:$0xff] }
 0x356   :  { %v354_v58 = vsel %vm59_vm0, %v298_v30, %v321_v50  ;;  %v2895_v50 = vpack.c.bf16 %v96_v49, %v95_v48 }
 0x357   :  { %2446 = vmatprep.subr.bf16.mxu0 %v2445_v51 }
 0x358   :  { %2448 = vmatpush3.bf16.msra.mxu0 %v2445_v51  ;;  %v86_v51 = vld [vmem:[#allocation4 + $0x78] sm:$0xff] }
 0x359   :  { %v333_v52 = vpop.permute.xlu0 %332 }
 0x35a   :  { %v358_v62 = vsel %vm61_vm1, %v354_v58, %v333_v52  ;;  %v87_v52 = vld [vmem:[#allocation4 + $0x80] sm:$0xff] }
 0x35d   :  { %v323_v53 = vpop.permute.xlu0 %322 }
 0x35e   :  { %v355_v54 = vsel %vm59_vm0, %v299_v31, %v323_v53  ;;  %v88_v53 = vld [vmem:[#allocation4 + $0x88] sm:$0xff] }
 0x361   :  { %v335_v55 = vpop.permute.xlu0 %334 }
 0x362   :  { %v359_v56 = vsel %vm61_vm1, %v355_v54, %v335_v55 }
 0x363   :  { %v363_v60 = vsel %vm63_vm2, %v359_v56, %v347_v57 }
 0x364   :  { %v367_v1 = vmul.f32 %v363_v60, %v2857_v59 }
 0x365   :  { %v345_v63 = vpop.permute.xlu0 %344 }
 0x366   :  { %v362_v0 = vsel %vm63_vm2, %v358_v62, %v345_v63 }
 0x367   :  { %v366_v2 = vmul.f32 %v362_v0, %v2860_v61 }
 0x369   :  { %v2449_v3 = vpack.c.bf16 %v367_v1, %v366_v2  ;;  %v51_v4 = vpop.permute.xlu0 %50 }
 0x36a   :  { %v60_v5 = vsel %vm59_vm0, %v44_v32, %v51_v4  ;;  %v89_v32 = vld [vmem:[#allocation4 + $0x90] sm:$0xff] }
 0x36b   :  { %2450 = vmatprep.subr.bf16.mxu0 %v2449_v3  ;;  %v62_v7 = vsel %vm61_vm1, %v60_v5, %v54_v6  ;;  %v2880_v34 = vpack.c.bf16 %v90_v33, %v89_v32  ;;  %v701_v33 = vld [vmem:[#allocation4 + $0x138] sm:$0xff] }
 0x36c   :  { %2452 = vmatpush3.bf16.msra.mxu0 %v2449_v3 }
 0x36d   :  { %v57_v8 = vpop.permute.xlu0 %56  ;;  %2454 = vmatprep.subr.bf16.mxu1 %v2880_v34 }
 0x36e   :  { %v64_v9 = vsel %vm63_vm2, %v62_v7, %v57_v8  ;;  %2456 = vmatpush3.bf16.msra.mxu1 %v2880_v34 }
 0x36f   :  { %2233 = vmatmul.mubr.msk.f32.vlgmr.msra.gmra.mrb[2].mxu0 %vm61_vm1, %v2819_v25  ;;  %v70_v10 = vrot.slane %v64_v9, %v2807_v19  ;;  %2458 = vmatprep.subr.bf16.mxu1 %v2884_v38 }
 0x371   :  { %v72_v12 = vmul.f32 %v70_v10, %v66_v11  ;;  %v71_v14 = vmul.f32 %v70_v10, %v65_v13 }
 0x372   :  { %2460 = vmatpush3.bf16.msra.mxu1 %v2884_v38 }
 0x373   :  { %v2052_v17 = vadd.f32 -1.0, %v72_v12  ;;  %v2051_v21 = vadd.f32 -1.0, %v71_v14  ;;  %2462 = vmatprep.subr.bf16.mxu1 %v2889_v45 }
 0x375   :  { %v2872_v22 = vmul.f32 1e+30, %v2052_v17  ;;  %v2874_v26 = vmul.f32 1e+30, %v2051_v21 }
 0x376   :  { %2464 = vmatpush3.bf16.msra.mxu1 %v2889_v45 }
 0x377   :  { %2466 = vmatprep.subr.bf16.mxu1 %v2895_v50 }
 0x37a   :  { %2468 = vmatpush3.bf16.msra.mxu1 %v2895_v50 }
 0x442   :  { %v2234_v23 = vpop.f32.mrb[2].mxu0 }
 0x443   :  { %v444_v27 = vadd.f32 %v2234_v23, %v2872_v22  ;;  %v438_v28 = vpop.f32.mrb[3].mxu0 }
 0x444   :  { %v439_v29 = vadd.f32 %v438_v28, %v2874_v26 }
 0x445   :  { %v451_v30 = vsel %vm447_vm3, %v444_v27, -inf }
 0x446   :  { %452 = vmax.xlane.f32.xlu0 %v451_v30  ;;  %v448_v31 = vsel %vm447_vm3, %v439_v29, -inf  ;;  %v699_v30 = vld [vmem:[#allocation4 + $0x128] sm:$0xff] }
 0x447   :  { %449 = vmax.xlane.f32.xlu1 %v448_v31  ;;  %v700_v31 = vld [vmem:[#allocation4 + $0x130] sm:$0xff] }
 0x458   :  { %555 = vrot.lane.b32.xlu1 %v82_v35, %s2746_s1 }
 0x45c   :  { %553 = vrot.lane.b32.xlu0 %v81_v39, %s2746_s1  ;;  %557 = vrot.lane.b32.xlu1 %v83_v40, %s2746_s1 }
 0x460   :  { %559 = vrot.lane.b32.xlu0 %v84_v46, %s2746_s1  ;;  %561 = vrot.lane.b32.xlu1 %v85_v47, %s2746_s1 }
 0x464   :  { %563 = vrot.lane.b32.xlu0 %v86_v51, %s2746_s1  ;;  %565 = vrot.lane.b32.xlu1 %v87_v52, %s2746_s1 }
 0x468   :  { %567 = vrot.lane.b32.xlu0 %v88_v53, %s2746_s1 }
 0x4d3   :  { %v453_v54 = vpop.xlane.xlu0 %452 }
 0x4d4   :  { %v455_v55 = vsub.f32 %v444_v27, %v453_v54  ;;  %v450_v56 = vpop.xlane.xlu1 %449 }
 0x4d5   :  { %v454_v57 = vsub.f32 %v439_v29, %v450_v56  ;;  %v698_v29 = vld [vmem:[#allocation4 + $0x120] sm:$0xff] }
 0x4d6   :  { %v458_v58 = vmul.f32 1.442695, %v455_v55  ;;  %v2485_v32 = vpack.c.bf16 %v699_v30, %v698_v29 }
 0x4d7   :  { %v456_v60 = vmul.f32 1.442695, %v454_v57  ;;  %v2904_v62 = vpop.permute.xlu0 %553 }
 0x4d8   :  { %v577_v63 = vmul.f32 %v2904_v62, %v2813_v24  ;;  %v2908_v0 = vpop.permute.xlu1 %555  ;;  %2486 = vmatprep.subr.bf16.mxu1 %v2485_v32 }
 0x4d9   :  { %2658 = vpow2.f32 %v456_v60  ;;  %v578_v1 = vmul.f32 %v2908_v0, %v2819_v25 }
 0x4da   :  { %2660 = vpow2.f32 %v458_v58 }
 0x4db   :  { %v2618_v2 = vpack.i.bf16 %v578_v1, %v577_v63  ;;  %v2912_v3 = vpop.permute.xlu0 %559 }
 0x4dc   :  { %v580_v4 = vmul.f32 %v2912_v3, %v2819_v25  ;;  %v2916_v5 = vpop.permute.xlu1 %557 }
 0x4dd   :  { %v579_v6 = vmul.f32 %v2916_v5, %v2813_v24  ;;  %2619 = vrot.lane.b32.xlu1 %v2618_v2, %s2746_s1 }
 0x4df   :  { %v2623_v7 = vpack.i.bf16 %v580_v4, %v579_v6  ;;  %v2921_v8 = vpop.permute.xlu0 %563  ;;  %v704_v4 = vsub.s32 1, %v2804_v18 }
 0x4e0   :  { %v582_v9 = vmul.f32 %v2921_v8, %v2819_v25  ;;  %v2925_v10 = vpop.permute.xlu1 %561 }
 0x4e1   :  { %v581_v11 = vmul.f32 %v2925_v10, %v2813_v24  ;;  %2624 = vrot.lane.b32.xlu0 %v2623_v7, %s2746_s1  ;;  %v705_v6 = vrot.slane %v2809_v20, %v704_v4 }
 0x4e3   :  { %v2659_v12 = vpop.eup %2658  ;;  %v2628_v13 = vpack.i.bf16 %v582_v9, %v581_v11  ;;  %v2930_v14 = vpop.permute.xlu0 %567 }
 0x4e4   :  { %v2661_v17 = vpop.eup %2660  ;;  %v584_v21 = vmul.f32 %v2930_v14, %v2819_v25  ;;  %2251 = vmatprep.mubr.msk.f32.mxu1 %vm447_vm3, %v2659_v12  ;;  %v2935_v23 = vpop.permute.xlu1 %565  ;;  %v2489_v25 = vpack.c.bf16 %v701_v33, %v700_v31 }
 0x4e5   :  { %v583_v27 = vmul.f32 %v2935_v23, %v2813_v24  ;;  %2252 = vmatmul.mubr.msk.f32.vlgmr.msra.gmra.mrb[2].mxu1 %vm447_vm3, %v2661_v17  ;;  %2629 = vrot.lane.b32.xlu1 %v2628_v13, %s2746_s1 }
 0x4e6   :  { %2488 = vmatpush3.bf16.msra.mxu1 %v2485_v32 }
 0x4e7   :  { %v2633_v28 = vpack.i.bf16 %v584_v21, %v583_v27  ;;  %2490 = vmatprep.subr.bf16.mxu1 %v2489_v25 }
 0x4e9   :  { %2634 = vrot.lane.b32.xlu0 %v2633_v28, %s2746_s1 }
 0x4ea   :  { %2492 = vmatpush3.bf16.msra.mxu1 %v2489_v25 }
 0x54f   :  { %v2620_v35 = vpop.permute.xlu1 %2619 }
 0x550   :  { %v2622_v36 = vunpack.i.h.bf16 %v2620_v35  ;;  %v2621_v37 = vunpack.i.l.bf16 %v2620_v35 }
 0x552   :  { %v2469_v24 = vpack.c.bf16 %v2622_v36, %v2621_v37  ;;  %v829_v37 = vld [vmem:[#allocation4 + $0x148] sm:$0xff] }
 0x553   :  { %v2625_v39 = vpop.permute.xlu0 %2624 }
 0x554   :  { %v2627_v40 = vunpack.i.h.bf16 %v2625_v39  ;;  %v2626_v41 = vunpack.i.l.bf16 %v2625_v39  ;;  %2470 = vmatprep.subr.bf16.mxu0 %v2469_v24  ;;  %v830_v39 = vld [vmem:[#allocation4 + $0x150] sm:$0xff] }
 0x555   :  { %2472 = vmatpush3.bf16.msra.mxu0 %v2469_v24 }
 0x556   :  { %v2473_v43 = vpack.c.bf16 %v2627_v40, %v2626_v41  ;;  %v831_v40 = vld [vmem:[#allocation4 + $0x158] sm:$0xff] }
 0x557   :  { %v2630_v46 = vpop.permute.xlu1 %2629  ;;  %v2497_v41 = vpack.c.bf16 %v831_v40, %v830_v39 }
 0x558   :  { %v2632_v47 = vunpack.i.h.bf16 %v2630_v46  ;;  %v2631_v48 = vunpack.i.l.bf16 %v2630_v46  ;;  %2474 = vmatprep.subr.bf16.mxu0 %v2473_v43  ;;  %v920_v46 = vld [vmem:[#allocation4 + $0x168] sm:$0xff] }
 0x559   :  { %2476 = vmatpush3.bf16.msra.mxu0 %v2473_v43  ;;  %v919_v43 = vld [vmem:[#allocation4 + $0x160] sm:$0xff] }
 0x55a   :  { %v2477_v49 = vpack.c.bf16 %v2632_v47, %v2631_v48  ;;  %v921_v47 = vld [vmem:[#allocation4 + $0x170] sm:$0xff]  ;;  %v2501_v48 = vpack.c.bf16 %v920_v46, %v919_v43 }
 0x55b   :  { %v2635_v51 = vpop.permute.xlu0 %2634 }
 0x55c   :  { %v2637_v52 = vunpack.i.h.bf16 %v2635_v51  ;;  %v2636_v53 = vunpack.i.l.bf16 %v2635_v51  ;;  %2478 = vmatprep.subr.bf16.mxu0 %v2477_v49  ;;  %2502 = vmatprep.subr.bf16.mxu1 %v2501_v48 }
 0x55d   :  { %2480 = vmatpush3.bf16.msra.mxu0 %v2477_v49  ;;  %v922_v49 = vld [vmem:[#allocation4 + $0x178] sm:$0xff] }
 0x55e   :  { %v2481_v54 = vpack.c.bf16 %v2637_v52, %v2636_v53  ;;  %v2505_v51 = vpack.c.bf16 %v922_v49, %v921_v47  ;;  %v923_v52 = vld [vmem:[#allocation4 + $0x180] sm:$0xff]  ;;  %v924_v53 = vld [vmem:[#allocation4 + $0x188] sm:$0xff] }
 0x560   :  { %2482 = vmatprep.subr.bf16.mxu0 %v2481_v54 }
 0x561   :  { %2484 = vmatpush3.bf16.msra.mxu0 %v2481_v54  ;;  %v2509_v54 = vpack.c.bf16 %v924_v53, %v923_v52 }
 0x5b8   :  { %v2253_v55 = vpop.f32.mrb[2].mxu1 }
 0x5b9   :  { %2662 = vrcp.f32 %v2253_v55  ;;  %v532_v56 = vpop.f32.mrb[3].mxu1 }
 0x5ba   :  { %2664 = vrcp.f32 %v532_v56 }
 0x5c3   :  { %v2663_v57 = vpop.eup %2662 }
 0x5c4   :  { %v2665_v58 = vpop.eup %2664  ;;  %v544_v63 = vmul.f32 %v2663_v57, %v2661_v17 }
 0x5c5   :  { %v543_v60 = vmul.f32 %v2665_v58, %v2659_v12 }
 0x5c7   :  { %2270 = vmatprep.mubr.msk.f32.mxu0 %vm447_vm3, %v543_v60 }
 0x5c8   :  { %2271 = vmatmul.mubr.msk.f32.vlgmr.msra.gmra.mrb[4].mxu0 %vm447_vm3, %v544_v63 }
 0x69b   :  { %v2272_v1 = vpop.f32.mrb[4].mxu0 }
 0x69c   :  { %v689_v2 = vpop.f32.mrb[5].mxu0 }
 0x69d   :  { %2281 = vmatprep.mubr.msk.f32.mxu1 %vm61_vm1, %v689_v2  ;;  %v824_v2 = vsub.s32 3, %v2804_v18 }
 0x69e   :  { %2282 = vmatmul.mubr.msk.f32.vlgmr.msra.gmra.mrb[4].mxu1 %vm61_vm1, %v2272_v1  ;;  %v818_v1 = vsub.s32 2, %v2804_v18 }
 0x69f   :  { %2504 = vmatpush3.bf16.msra.mxu1 %v2501_v48 }
 0x6a0   :  { %2506 = vmatprep.subr.bf16.mxu1 %v2505_v51 }
 0x6a3   :  { %2508 = vmatpush3.bf16.msra.mxu1 %v2505_v51 }
 0x6a4   :  { %2510 = vmatprep.subr.bf16.mxu1 %v2509_v54 }
 0x6a7   :  { %2512 = vmatpush3.bf16.msra.mxu1 %v2509_v54 }
 0x771   :  { %v2283_v7 = vpop.f32.mrb[4].mxu1 }
 0x772   :  { %v784_v9 = vadd.f32 %v2283_v7, %v705_v6  ;;  %v778_v11 = vpop.f32.mrb[5].mxu1 }
 0x773   :  { %v779_v12 = vadd.f32 %v778_v11, %v705_v6  ;;  %v819_v6 = vrot.slane %v2809_v20, %v818_v1 }
 0x774   :  { %v788_v13 = vadd.f32 %v784_v9, %v2798_v16 }
 0x775   :  { %v787_v17 = vadd.f32 %v779_v12, %v2796_v15  ;;  %v828_v15 = vld [vmem:[#allocation4 + $0x140] sm:$0xff] }
 0x776   :  { %v792_v21 = vsel %vm61_vm1, %v788_v13, 0.0  ;;  %v2493_v24 = vpack.c.bf16 %v829_v37, %v828_v15 }
 0x777   :  { %793 = vadd.xlane.f32.xlu0 %v792_v21  ;;  %v789_v27 = vsel %vm61_vm1, %v787_v17, 0.0 }
 0x778   :  { %790 = vadd.xlane.f32.xlu1 %v789_v27  ;;  %2494 = vmatprep.subr.bf16.mxu0 %v2493_v24 }
 0x779   :  { %2496 = vmatpush3.bf16.msra.mxu0 %v2493_v24  ;;  %v929_v24 = vsub.s32 5, %v2804_v18 }
 0x77a   :  { %2498 = vmatprep.subr.bf16.mxu0 %v2497_v41 }
 0x77b   :  { %v930_v39 = vrot.slane %v2809_v20, %v929_v24 }
 0x77d   :  { %2500 = vmatpush3.bf16.msra.mxu0 %v2497_v41 }
 0x804   :  { %v794_v28 = vpop.xlane.xlu0 %793 }
 0x805   :  { %v797_v29 = vmul.f32 0.03125, %v794_v28  ;;  %v791_v30 = vpop.xlane.xlu1 %790 }
 0x806   :  { %v796_v31 = vmul.f32 0.03125, %v791_v30  ;;  %v926_v30 = vld [vmem:[#allocation4 + $0x198] sm:$0xff] }
 0x807   :  { %v799_v32 = vsub.f32 %v788_v13, %v797_v29  ;;  %v825_v13 = vrot.slane %v2809_v20, %v824_v2  ;;  %v925_v29 = vld [vmem:[#allocation4 + $0x190] sm:$0xff] }
 0x808   :  { %v798_v33 = vsub.f32 %v787_v17, %v796_v31  ;;  %v2513_v31 = vpack.c.bf16 %v926_v30, %v925_v29  ;;  %v1048_v29 = vsub.s32 7, %v2804_v18 }
 0x809   :  { %v801_v25 = vmul.f32 %v799_v32, %v799_v32 }
 0x80a   :  { %v800_v35 = vmul.f32 %v798_v33, %v798_v33  ;;  %2514 = vmatprep.subr.bf16.mxu1 %v2513_v31 }
 0x80b   :  { %v805_v36 = vsel %vm61_vm1, %v801_v25, 0.0  ;;  %2516 = vmatpush3.bf16.msra.mxu1 %v2513_v31 }
 0x80c   :  { %806 = vadd.xlane.f32.xlu1 %v805_v36  ;;  %v802_v16 = vsel %vm61_vm1, %v800_v35, 0.0  ;;  %2534 = vmatprep.subr.bf16.mxu1 %v2880_v34 }
 0x80d   :  { %803 = vadd.xlane.f32.xlu0 %v802_v16 }
 0x899   :  { %v807_v55 = vpop.xlane.xlu1 %806 }
 0x89a   :  { %v809_v56 = vmul.f32 0.03125, %v807_v55  ;;  %v804_v57 = vpop.xlane.xlu0 %803 }
 0x89b   :  { %v808_v58 = vmul.f32 0.03125, %v804_v57 }
 0x89c   :  { %v811_v60 = vadd.f32 1e-05, %v809_v56 }
 0x89d   :  { %v810_v63 = vadd.f32 1e-05, %v808_v58  ;;  %v1053_v58 = vld [vmem:[#allocation4 + $0x1a8] sm:$0xff] }
 0x89e   :  { %2666 = vrsqrt.f32 %v811_v60  ;;  %v1054_v60 = vld [vmem:[#allocation4 + $0x1b0] sm:$0xff] }
 0x89f   :  { %2668 = vrsqrt.f32 %v810_v63  ;;  %v2517_v63 = vpack.c.bf16 %v1054_v60, %v1053_v58 }
 0x8a1   :  { %2518 = vmatprep.subr.bf16.mxu0 %v2517_v63 }
 0x8a8   :  { %v2667_v7 = vpop.eup %2666 }
 0x8a9   :  { %v2669_v9 = vpop.eup %2668  ;;  %v815_v11 = vmul.f32 %v2667_v7, %v799_v32  ;;  %v834_v32 = vsub.s32 4, %v2804_v18  ;;  %v1056_v7 = vld [vmem:[#allocation4 + $0x1c0] sm:$0xff] }
 0x8aa   :  { %v814_v12 = vmul.f32 %v2669_v9, %v798_v33 }
 0x8ab   :  { %v821_v17 = vmul.f32 %v819_v6, %v815_v11  ;;  %v835_v33 = vrot.slane %v2809_v20, %v834_v32 }
 0x8ac   :  { %v820_v21 = vmul.f32 %v819_v6, %v814_v12  ;;  %v1055_v6 = vld [vmem:[#allocation4 + $0x1b8] sm:$0xff] }
 0x8ad   :  { %v827_v28 = vadd.f32 %v825_v13, %v821_v17  ;;  %v2521_v9 = vpack.c.bf16 %v1056_v7, %v1055_v6 }
 0x8ae   :  { %v826_v27 = vadd.f32 %v825_v13, %v820_v21 }
 0x8b0   :  { %2292 = vmatprep.mubr.msk.f32.mxu0 %vm61_vm1, %v826_v27 }
 0x8b1   :  { %2293 = vmatmul.mubr.msk.f32.vlgmr.msra.gmra.mrb[6].mxu0 %vm61_vm1, %v827_v28 }
 0x8b2   :  { %2520 = vmatpush3.bf16.msra.mxu0 %v2517_v63 }
 0x8b3   :  { %2522 = vmatprep.subr.bf16.mxu0 %v2521_v9 }
 0x8b6   :  { %2524 = vmatpush3.bf16.msra.mxu0 %v2521_v9 }
 0x984   :  { %v2294_v25 = vpop.f32.mrb[6].mxu0 }
 0x985   :  { %v914_v35 = vadd.f32 %v2294_v25, %v835_v33  ;;  %v908_v36 = vpop.f32.mrb[7].mxu0 }
 0x986   :  { %v909_v16 = vadd.f32 %v908_v36, %v835_v33  ;;  %v1049_v36 = vrot.slane %v2809_v20, %v1048_v29 }
 0x987   :  { %v918_v37 = vmax.f32 %v914_v35, 0.0 }
 0x988   :  { %v917_v15 = vmax.f32 %v909_v16, 0.0 }
 0x98a   :  { %2311 = vmatprep.mubr.msk.f32.mxu1 %vm447_vm3, %v917_v15 }
 0x98b   :  { %2312 = vmatmul.mubr.msk.f32.vlgmr.msra.gmra.mrb[6].mxu1 %vm447_vm3, %v918_v37 }
 0x98c   :  { %2536 = vmatpush3.bf16.msra.mxu1 %v2880_v34 }
 0x98d   :  { %2538 = vmatprep.subr.bf16.mxu1 %v2884_v38 }
 0x990   :  { %2540 = vmatpush3.bf16.msra.mxu1 %v2884_v38 }
 0x991   :  { %2542 = vmatprep.subr.bf16.mxu1 %v2889_v45 }
 0x994   :  { %2544 = vmatpush3.bf16.msra.mxu1 %v2889_v45 }
 0x995   :  { %2546 = vmatprep.subr.bf16.mxu1 %v2895_v50 }
 0x998   :  { %2548 = vmatpush3.bf16.msra.mxu1 %v2895_v50 }
 0xa5e   :  { %v2313_v40 = vpop.f32.mrb[6].mxu1 }
 0xa5f   :  { %v1009_v34 = vadd.f32 %v2313_v40, %v930_v39  ;;  %v1003_v41 = vpop.f32.mrb[7].mxu1  ;;  %v3004_v40 = vld [vmem:[#allocation4 + $0x248] sm:$0xff] }
 0xa60   :  { %v1004_v43 = vadd.f32 %v1003_v41, %v930_v39 }
 0xa61   :  { %v1013_v46 = vadd.f32 %v1009_v34, %v827_v28  ;;  %v1042_v28 = vsub.s32 6, %v2804_v18  ;;  %v1060_v34 = vrot.slane %v3004_v40, %v2807_v19 }
 0xa62   :  { %v1012_v38 = vadd.f32 %v1004_v43, %v826_v27 }
 0xa63   :  { %v1017_v47 = vsel %vm61_vm1, %v1013_v46, 0.0  ;;  %v1043_v30 = vrot.slane %v2809_v20, %v1042_v28 }
 0xa64   :  { %1018 = vadd.xlane.f32.xlu1 %v1017_v47  ;;  %v1014_v45 = vsel %vm61_vm1, %v1012_v38, 0.0 }
 0xa65   :  { %1015 = vadd.xlane.f32.xlu0 %v1014_v45 }
 0xaf1   :  { %v1019_v48 = vpop.xlane.xlu1 %1018 }
 0xaf2   :  { %v1021_v50 = vmul.f32 0.03125, %v1019_v48  ;;  %v1016_v49 = vpop.xlane.xlu0 %1015 }
 0xaf3   :  { %v1020_v51 = vmul.f32 0.03125, %v1016_v49 }
 0xaf4   :  { %v1023_v52 = vsub.f32 %v1013_v46, %v1021_v50 }
 0xaf5   :  { %v1022_v53 = vsub.f32 %v1012_v38, %v1020_v51 }
 0xaf6   :  { %v1025_v54 = vmul.f32 %v1023_v52, %v1023_v52 }
 0xaf7   :  { %v1024_v55 = vmul.f32 %v1022_v53, %v1022_v53 }
 0xaf8   :  { %v1029_v56 = vsel %vm61_vm1, %v1025_v54, 0.0 }
 0xaf9   :  { %1030 = vadd.xlane.f32.xlu1 %v1029_v56  ;;  %v1026_v57 = vsel %vm61_vm1, %v1024_v55, 0.0 }
 0xafa   :  { %1027 = vadd.xlane.f32.xlu0 %v1026_v57 }
 0xb86   :  { %v1031_v11 = vpop.xlane.xlu1 %1030 }
 0xb87   :  { %v1033_v12 = vmul.f32 0.03125, %v1031_v11  ;;  %v1028_v13 = vpop.xlane.xlu0 %1027 }
 0xb88   :  { %v1032_v17 = vmul.f32 0.03125, %v1028_v13 }
 0xb89   :  { %v1035_v21 = vadd.f32 1e-05, %v1033_v12 }
 0xb8a   :  { %v1034_v27 = vadd.f32 1e-05, %v1032_v17 }
 0xb8b   :  { %2670 = vrsqrt.f32 %v1035_v21 }
 0xb8c   :  { %2672 = vrsqrt.f32 %v1034_v27 }
 0xb95   :  { %v2671_v31 = vpop.eup %2670 }
 0xb96   :  { %v2673_v33 = vpop.eup %2672  ;;  %v1039_v25 = vmul.f32 %v2671_v31, %v1023_v52 }
 0xb97   :  { %v1038_v35 = vmul.f32 %v2673_v33, %v1022_v53 }
 0xb98   :  { %v1045_v16 = vmul.f32 %v1043_v30, %v1039_v25 }
 0xb99   :  { %v1044_v15 = vmul.f32 %v1043_v30, %v1038_v35 }
 0xb9a   :  { %v2998_v39 = vadd.f32 %v1049_v36, %v1045_v16 }
 0xb9b   :  { %v2996_v37 = vadd.f32 %v1049_v36, %v1044_v15 }
 0xb9d   :  { %2322 = vmatprep.mubr.msk.f32.mxu0 %vm61_vm1, %v2996_v37 }
 0xb9e   :  { %2323 = vmatmul.mubr.msk.f32.vlgmr.msra.gmra.mrb[8].mxu0 %vm61_vm1, %v2998_v39 }
 0xc71   :  { %v2324_v41 = vpop.f32.mrb[8].mxu0 }
 0xc72   :  { %v3008_v43 = vadd.f32 %v2324_v41, %v1060_v34  ;;  %v1133_v20 = vpop.f32.mrb[9].mxu0 }
 0xc73   :  { %v3010_v46 = vadd.f32 %v1133_v20, %v1060_v34 }
 0xc74   :  { %1146 = vrot.lane.b32.xlu1 %v3008_v43, %s2742_s2  ;;  %v1417_v49 = vmul.f32 %v3008_v43, %v2912_v3  ;;  %v1419_v54 = vmul.f32 %v3008_v43, %v2921_v8  ;;  %v1421_v55 = vmul.f32 %v3008_v43, %v2930_v14 }
 0xc75   :  { %1144 = vrot.lane.b32.xlu0 %v3010_v46, %s2742_s2  ;;  %2333 = vmatprep.mubr.msk.f32.mxu0 %vm61_vm1, %v3010_v46  ;;  %v1416_v50 = vmul.f32 %v3010_v46, %v2916_v5  ;;  %v1418_v53 = vmul.f32 %v3010_v46, %v2925_v10  ;;  %v1420_v3 = vmul.f32 %v3010_v46, %v2935_v23 }
 0xc77   :  { %v2643_v52 = vpack.i.bf16 %v1417_v49, %v1416_v50  ;;  %v2648_v5 = vpack.i.bf16 %v1419_v54, %v1418_v53  ;;  %v2653_v56 = vpack.i.bf16 %v1421_v55, %v1420_v3 }
 0xce6   :  { %v1147_v47 = vpop.permute.xlu1 %1146 }
 0xce7   :  { %v1145_v38 = vpop.permute.xlu0 %1144 }
 0xce8   :  { %1150 = vxpose.xlu1.b32.start [1/2] (short) (narrow) %v1145_v38, 32 }
 0xcec   :  { %1151 = vxpose.xlu1.b32.end [2/2] (short) (narrow) %v1147_v47, 32 }
 0xd68   :  { %v1166_v19 = vpop.trf.xlu1 }
 0xd69   :  { %1186 = vrot.lane.b32.xlu0 %v1166_v19, %s2743_s10 }
 0xd6c   :  { %v1167_v45 = vpop.trf.xlu1 }
 0xd6d   :  { %1198 = vrot.lane.b32.xlu0 %v1166_v19, %s2744_s11 }
 0xd70   :  { %v1168_v48 = vpop.trf.xlu1 }
 0xd71   :  { %1210 = vrot.lane.b32.xlu0 %v1166_v19, %s2745_s12 }
 0xd74   :  { %v1169_v51 = vpop.trf.xlu1 }
 0xd75   :  { %1188 = vrot.lane.b32.xlu0 %v1167_v45, %s2743_s10  ;;  %1216 = vrot.lane.b32.xlu1 %v1169_v51, %s2745_s12 }
 0xd79   :  { %1200 = vrot.lane.b32.xlu0 %v1167_v45, %s2744_s11  ;;  %2644 = vrot.lane.b32.xlu1 %v2643_v52, %s2746_s1 }
 0xd7d   :  { %1212 = vrot.lane.b32.xlu0 %v1167_v45, %s2745_s12  ;;  %2649 = vrot.lane.b32.xlu1 %v2648_v5, %s2746_s1 }
 0xd81   :  { %1190 = vrot.lane.b32.xlu0 %v1168_v48, %s2743_s10  ;;  %2654 = vrot.lane.b32.xlu1 %v2653_v56, %s2746_s1 }
 0xd85   :  { %1202 = vrot.lane.b32.xlu0 %v1168_v48, %s2744_s11 }
 0xd89   :  { %1192 = vrot.lane.b32.xlu0 %v1169_v51, %s2743_s10 }
 0xd8d   :  { %1204 = vrot.lane.b32.xlu0 %v1169_v51, %s2744_s11 }
 0xd91   :  { %1214 = vrot.lane.b32.xlu0 %v1168_v48, %s2745_s12 }
 0xddb   :  { %v1187_v8 = vpop.permute.xlu0 %1186 }
 0xddc   :  { %v1222_v58 = vsel %vm59_vm0, %v1166_v19, %v1187_v8 }
 0xddf   :  { %v1199_v10 = vpop.permute.xlu0 %1198 }
 0xde0   :  { %v1226_v60 = vsel %vm61_vm1, %v1222_v58, %v1199_v10 }
 0xde3   :  { %v1211_v14 = vpop.permute.xlu0 %1210 }
 0xde4   :  { %v1230_v63 = vsel %vm63_vm2, %v1226_v60, %v1211_v14 }
 0xde5   :  { %v1234_v12 = vmul.f32 %v1230_v63, %v2845_v42 }
 0xde7   :  { %v1189_v23 = vpop.permute.xlu0 %1188  ;;  %v1217_v35 = vpop.permute.xlu1 %1216 }
 0xde8   :  { %v1223_v6 = vsel %vm59_vm0, %v1167_v45, %v1189_v23 }
 0xdeb   :  { %v1201_v57 = vpop.permute.xlu0 %1200 }
 0xdec   :  { %v1227_v7 = vsel %vm61_vm1, %v1223_v6, %v1201_v57 }
 0xdef   :  { %v1213_v9 = vpop.permute.xlu0 %1212 }
 0xdf0   :  { %v1231_v11 = vsel %vm63_vm2, %v1227_v7, %v1213_v9  ;;  %v1535_v9 = vld [vmem:[#allocation4 + $0x1c8] sm:$0xff] }
 0xdf1   :  { %v1235_v13 = vmul.f32 %v1231_v11, %v2848_v44  ;;  %v1536_v11 = vld [vmem:[#allocation4 + $0x1d0] sm:$0xff] }
 0xdf3   :  { %v1191_v17 = vpop.permute.xlu0 %1190  ;;  %v2525_v21 = vpack.c.bf16 %v1235_v13, %v1234_v12  ;;  %v1537_v12 = vld [vmem:[#allocation4 + $0x1d8] sm:$0xff]  ;;  %v2565_v13 = vpack.c.bf16 %v1536_v11, %v1535_v9 }
 0xdf4   :  { %v1224_v36 = vsel %vm59_vm0, %v1168_v48, %v1191_v17  ;;  %v1538_v17 = vld [vmem:[#allocation4 + $0x1e0] sm:$0xff] }
 0xdf5   :  { %2526 = vmatprep.subr.bf16.mxu0 %v2525_v21  ;;  %2566 = vmatprep.subr.bf16.mxu1 %v2565_v13 }
 0xdf6   :  { %2528 = vmatpush3.bf16.msra.mxu0 %v2525_v21  ;;  %v2569_v21 = vpack.c.bf16 %v1538_v17, %v1537_v12 }
 0xdf7   :  { %v1203_v27 = vpop.permute.xlu0 %1202 }
 0xdf8   :  { %v1228_v42 = vsel %vm61_vm1, %v1224_v36, %v1203_v27 }
 0xdfb   :  { %v1193_v30 = vpop.permute.xlu0 %1192 }
 0xdfc   :  { %v1225_v31 = vsel %vm59_vm0, %v1169_v51, %v1193_v30 }
 0xdff   :  { %v1205_v33 = vpop.permute.xlu0 %1204 }
 0xe00   :  { %v1229_v25 = vsel %vm61_vm1, %v1225_v31, %v1205_v33 }
 0xe01   :  { %v1233_v16 = vsel %vm63_vm2, %v1229_v25, %v1217_v35 }
 0xe02   :  { %v1237_v34 = vmul.f32 %v1233_v16, %v2857_v59  ;;  %v1414_v59 = vmul.f32 %v3010_v46, %v2904_v62 }
 0xe03   :  { %v1215_v15 = vpop.permute.xlu0 %1214 }
 0xe04   :  { %v1232_v44 = vsel %vm63_vm2, %v1228_v42, %v1215_v15  ;;  %v1542_v42 = vrot.slane %v3004_v40, %v704_v4 }
 0xe05   :  { %v1236_v41 = vmul.f32 %v1232_v44, %v2860_v61  ;;  %v1415_v61 = vmul.f32 %v3008_v43, %v2908_v0 }
 0xe07   :  { %v2529_v20 = vpack.c.bf16 %v1237_v34, %v1236_v41  ;;  %v2638_v49 = vpack.i.bf16 %v1415_v61, %v1414_v59 }
 0xe09   :  { %2530 = vmatprep.subr.bf16.mxu0 %v2529_v20 }
 0xe0a   :  { %2532 = vmatpush3.bf16.msra.mxu0 %v2529_v20 }
 0xe0d   :  { %2334 = vmatmul.mubr.msk.f32.vlgmr.msra.gmra.mrb[10].mxu0 %vm61_vm1, %v3008_v43 }
 0xee0   :  { %v2335_v38 = vpop.f32.mrb[10].mxu0 }
 0xee1   :  { %v1308_v47 = vpop.f32.mrb[11].mxu0  ;;  %v1314_v45 = vadd.f32 %v2335_v38, %v2872_v22 }
 0xee2   :  { %v1309_v19 = vadd.f32 %v1308_v47, %v2874_v26  ;;  %v2645_v26 = vpop.permute.xlu1 %2644 }
 0xee3   :  { %v1320_v50 = vsel %vm447_vm3, %v1314_v45, -inf  ;;  %v2647_v3 = vunpack.i.h.bf16 %v2645_v26  ;;  %v2646_v8 = vunpack.i.l.bf16 %v2645_v26  ;;  %v1665_v26 = vld [vmem:[#allocation4 + $0x1f0] sm:$0xff] }
 0xee4   :  { %v1317_v48 = vsel %vm447_vm3, %v1309_v19, -inf }
 0xee5   :  { %1318 = vmax.xlane.f32.xlu0 %v1317_v48  ;;  %v2553_v0 = vpack.c.bf16 %v2647_v3, %v2646_v8  ;;  %v1755_v3 = vld [vmem:[#allocation4 + $0x208] sm:$0xff] }
 0xee6   :  { %v2650_v55 = vpop.permute.xlu1 %2649 }
 0xee7   :  { %v2652_v43 = vunpack.i.h.bf16 %v2650_v55  ;;  %v2651_v14 = vunpack.i.l.bf16 %v2650_v55  ;;  %v1756_v55 = vld [vmem:[#allocation4 + $0x210] sm:$0xff] }
 0xee8   :  { %v2581_v8 = vpack.c.bf16 %v1756_v55, %v1755_v3 }
 0xee9   :  { %1321 = vmax.xlane.f32.xlu0 %v1320_v50  ;;  %v2557_v58 = vpack.c.bf16 %v2652_v43, %v2651_v14 }
 0xeea   :  { %v2655_v23 = vpop.permute.xlu1 %2654 }
 0xeeb   :  { %v2657_v60 = vunpack.i.h.bf16 %v2655_v23  ;;  %v2656_v63 = vunpack.i.l.bf16 %v2655_v23 }
 0xeed   :  { %v2561_v7 = vpack.c.bf16 %v2657_v60, %v2656_v63 }
 0xeff   :  { %2639 = vrot.lane.b32.xlu0 %v2638_v49, %s2746_s1 }
 0xf72   :  { %v1319_v51 = vpop.xlane.xlu0 %1318 }
 0xf73   :  { %v1323_v52 = vsub.f32 %v1309_v19, %v1319_v51 }
 0xf75   :  { %v1325_v53 = vmul.f32 1.442695, %v1323_v52 }
 0xf76   :  { %v1322_v22 = vpop.xlane.xlu0 %1321 }
 0xf77   :  { %2674 = vpow2.f32 %v1325_v53  ;;  %v1324_v54 = vsub.f32 %v1314_v45, %v1322_v22  ;;  %v1666_v22 = vld [vmem:[#allocation4 + $0x1f8] sm:$0xff] }
 0xf79   :  { %v1327_v5 = vmul.f32 1.442695, %v1324_v54  ;;  %v1667_v54 = vld [vmem:[#allocation4 + $0x200] sm:$0xff] }
 0xf7a   :  { %v2640_v56 = vpop.permute.xlu0 %2639 }
 0xf7b   :  { %2676 = vpow2.f32 %v1327_v5  ;;  %v2642_v62 = vunpack.i.h.bf16 %v2640_v56  ;;  %v2641_v46 = vunpack.i.l.bf16 %v2640_v56  ;;  %v2577_v5 = vpack.c.bf16 %v1667_v54, %v1666_v22  ;;  %v1757_v56 = vld [vmem:[#allocation4 + $0x218] sm:$0xff] }
 0xf7d   :  { %v2549_v10 = vpack.c.bf16 %v2642_v62, %v2641_v46  ;;  %v1758_v62 = vld [vmem:[#allocation4 + $0x220] sm:$0xff] }
 0xf7e   :  { %v2585_v46 = vpack.c.bf16 %v1758_v62, %v1757_v56  ;;  %v1879_v56 = vrot.slane %v3004_v40, %v1042_v28  ;;  %v1964_v28 = vld [vmem:[#allocation4 + $0xe8] sm:$0xff] }
 0xf7f   :  { %2550 = vmatprep.subr.bf16.mxu0 %v2549_v10 }
 0xf80   :  { %2552 = vmatpush3.bf16.msra.mxu0 %v2549_v10  ;;  %v1759_v10 = vld [vmem:[#allocation4 + $0x228] sm:$0xff] }
 0xf81   :  { %v2675_v57 = vpop.eup %2674  ;;  %2554 = vmatprep.subr.bf16.mxu0 %v2553_v0 }
 0xf82   :  { %2352 = vmatprep.mubr.msk.f32.mxu1 %vm447_vm3, %v2675_v57 }
 0xf84   :  { %2556 = vmatpush3.bf16.msra.mxu0 %v2553_v0  ;;  %v1760_v0 = vld [vmem:[#allocation4 + $0x230] sm:$0xff] }
 0xf85   :  { %v2677_v6 = vpop.eup %2676  ;;  %2558 = vmatprep.subr.bf16.mxu0 %v2557_v58  ;;  %v2589_v43 = vpack.c.bf16 %v1760_v0, %v1759_v10  ;;  %v1885_v10 = vrot.slane %v3004_v40, %v1048_v29 }
 0xf86   :  { %2353 = vmatmul.mubr.msk.f32.vlgmr.msra.gmra.mrb[8].mxu1 %vm447_vm3, %v2677_v6 }
 0xf87   :  { %2568 = vmatpush3.bf16.msra.mxu1 %v2565_v13  ;;  %v1661_v13 = vrot.slane %v3004_v40, %v824_v2 }
 0xf88   :  { %2560 = vmatpush3.bf16.msra.mxu0 %v2557_v58  ;;  %2570 = vmatprep.subr.bf16.mxu1 %v2569_v21 }
 0xf89   :  { %2562 = vmatprep.subr.bf16.mxu0 %v2561_v7 }
 0xf8b   :  { %2572 = vmatpush3.bf16.msra.mxu1 %v2569_v21 }
 0xf8c   :  { %2564 = vmatpush3.bf16.msra.mxu0 %v2561_v7  ;;  %2582 = vmatprep.subr.bf16.mxu1 %v2581_v8 }
0x1059   :  { %v2354_v27 = vpop.f32.mrb[8].mxu1 }
0x105a   :  { %2678 = vrcp.f32 %v2354_v27  ;;  %v1401_v30 = vpop.f32.mrb[9].mxu1 }
0x105b   :  { %2680 = vrcp.f32 %v1401_v30 }
0x1064   :  { %v2679_v31 = vpop.eup %2678 }
0x1065   :  { %v2681_v33 = vpop.eup %2680  ;;  %v1413_v35 = vmul.f32 %v2679_v31, %v2677_v6  ;;  %v1655_v6 = vrot.slane %v3004_v40, %v818_v1  ;;  %v1761_v31 = vld [vmem:[#allocation4 + $0x238] sm:$0xff]  ;;  %v1671_v1 = vrot.slane %v3004_v40, %v834_v32 }
0x1066   :  { %v1412_v25 = vmul.f32 %v2681_v33, %v2675_v57  ;;  %v1762_v33 = vld [vmem:[#allocation4 + $0x240] sm:$0xff] }
0x1068   :  { %2371 = vmatprep.mubr.msk.f32.mxu0 %vm447_vm3, %v1412_v25  ;;  %v2593_v25 = vpack.c.bf16 %v1762_v33, %v1761_v31 }
0x1069   :  { %2372 = vmatmul.mubr.msk.f32.vlgmr.msra.gmra.mrb[12].mxu0 %vm447_vm3, %v1413_v35 }
0x113c   :  { %v2373_v36 = vpop.f32.mrb[12].mxu0 }
0x113d   :  { %v1526_v16 = vpop.f32.mrb[13].mxu0 }
0x113e   :  { %2382 = vmatprep.mubr.msk.f32.mxu1 %vm61_vm1, %v1526_v16 }
0x113f   :  { %2383 = vmatmul.mubr.msk.f32.vlgmr.msra.gmra.mrb[10].mxu1 %vm61_vm1, %v2373_v36 }
0x1140   :  { %2584 = vmatpush3.bf16.msra.mxu1 %v2581_v8 }
0x1141   :  { %2586 = vmatprep.subr.bf16.mxu1 %v2585_v46 }
0x1144   :  { %2588 = vmatpush3.bf16.msra.mxu1 %v2585_v46 }
0x1145   :  { %2590 = vmatprep.subr.bf16.mxu1 %v2589_v43 }
0x1148   :  { %2592 = vmatpush3.bf16.msra.mxu1 %v2589_v43 }
0x1149   :  { %2594 = vmatprep.subr.bf16.mxu1 %v2593_v25 }
0x114c   :  { %2596 = vmatpush3.bf16.msra.mxu1 %v2593_v25 }
0x1212   :  { %v2384_v15 = vpop.f32.mrb[10].mxu1 }
0x1213   :  { %v1621_v44 = vadd.f32 %v2384_v15, %v1542_v42  ;;  %v1615_v34 = vpop.f32.mrb[11].mxu1 }
0x1214   :  { %v1616_v41 = vadd.f32 %v1615_v34, %v1542_v42 }
0x1215   :  { %v1625_v20 = vadd.f32 %v1621_v44, %v2998_v39  ;;  %v1766_v44 = vrot.slane %v3004_v40, %v929_v24 }
0x1216   :  { %v1624_v38 = vadd.f32 %v1616_v41, %v2996_v37  ;;  %v1664_v37 = vld [vmem:[#allocation4 + $0x1e8] sm:$0xff] }
0x1217   :  { %v1629_v47 = vsel %vm61_vm1, %v1625_v20, 0.0  ;;  %v2573_v53 = vpack.c.bf16 %v1665_v26, %v1664_v37  ;;  %v2747_v37 = vmov 0.0|0.0   ;;  %v2749_v26 = vmov 0.0  }
0x1218   :  { %1630 = vadd.xlane.f32.xlu0 %v1629_v47  ;;  %v1626_v19 = vsel %vm61_vm1, %v1624_v38, 0.0 }
0x1219   :  { %1627 = vadd.xlane.f32.xlu1 %v1626_v19  ;;  %2574 = vmatprep.subr.bf16.mxu0 %v2573_v53 }
0x121a   :  { %2576 = vmatpush3.bf16.msra.mxu0 %v2573_v53 }
0x121b   :  { %2578 = vmatprep.subr.bf16.mxu0 %v2577_v5 }
0x121e   :  { %2580 = vmatpush3.bf16.msra.mxu0 %v2577_v5 }
0x121f   :  { %2597 = vmatprep.subr.bf16.mxu0 %v2747_v37 }
0x12a5   :  { %v1631_v45 = vpop.xlane.xlu0 %1630 }
0x12a6   :  { %v1633_v48 = vmul.f32 0.03125, %v1631_v45  ;;  %v1628_v50 = vpop.xlane.xlu1 %1627 }
0x12a7   :  { %v1632_v59 = vmul.f32 0.03125, %v1628_v50 }
0x12a8   :  { %v1635_v61 = vsub.f32 %v1625_v20, %v1633_v48 }
0x12a9   :  { %v1634_v4 = vsub.f32 %v1624_v38, %v1632_v59 }
0x12aa   :  { %v1637_v49 = vmul.f32 %v1635_v61, %v1635_v61 }
0x12ab   :  { %v1636_v51 = vmul.f32 %v1634_v4, %v1634_v4 }
0x12ac   :  { %v1641_v52 = vsel %vm61_vm1, %v1637_v49, 0.0 }
0x12ad   :  { %1642 = vadd.xlane.f32.xlu0 %v1641_v52  ;;  %v1638_v39 = vsel %vm61_vm1, %v1636_v51, 0.0 }
0x12ae   :  { %1639 = vadd.xlane.f32.xlu1 %v1638_v39 }
0x133a   :  { %v1643_v14 = vpop.xlane.xlu0 %1642 }
0x133b   :  { %v1645_v23 = vmul.f32 0.03125, %v1643_v14  ;;  %v1640_v57 = vpop.xlane.xlu1 %1639 }
0x133c   :  { %v1644_v58 = vmul.f32 0.03125, %v1640_v57 }
0x133d   :  { %v1647_v60 = vadd.f32 1e-05, %v1645_v23 }
0x133e   :  { %v1646_v63 = vadd.f32 1e-05, %v1644_v58  ;;  %v1962_v58 = vld [vmem:[#allocation4 + $0xd8] sm:$0xff] }
0x133f   :  { %2682 = vrsqrt.f32 %v1647_v60  ;;  %v1963_v60 = vld [vmem:[#allocation4 + $0xe0] sm:$0xff] }
0x1340   :  { %2684 = vrsqrt.f32 %v1646_v63 }
0x1349   :  { %v2683_v7 = vpop.eup %2682 }
0x134a   :  { %v2685_v9 = vpop.eup %2684  ;;  %v1651_v11 = vmul.f32 %v2683_v7, %v1635_v61  ;;  %v2601_v7 = vpack.c.bf16 %v1963_v60, %v1962_v58 }
0x134b   :  { %v1650_v12 = vmul.f32 %v2685_v9, %v1634_v4  ;;  %v1965_v9 = vld [vmem:[#allocation4 + $0xf0] sm:$0xff] }
0x134c   :  { %v1657_v17 = vmul.f32 %v1655_v6, %v1651_v11  ;;  %v2604_v18 = vpack.c.bf16 %v1965_v9, %v1964_v28  ;;  %v2084_v11 = vld [vmem:[#allocation4 + $0xf8] ss:$0 sm:$0xff] }
0x134d   :  { %v1656_v21 = vmul.f32 %v1655_v6, %v1650_v12  ;;  %v1888_v6 = vld [vmem:[#allocation4 + $0xd0] sm:$0xff] }
0x134e   :  { %v1663_v30 = vadd.f32 %v1661_v13, %v1657_v17 }
0x134f   :  { %v1662_v27 = vadd.f32 %v1661_v13, %v1656_v21 }
0x1351   :  { %2393 = vmatprep.mubr.msk.f32.mxu0 %vm61_vm1, %v1662_v27 }
0x1352   :  { %2394 = vmatmul.mubr.msk.f32.vlgmr.msra.gmra.mrb[14].mxu0 %vm61_vm1, %v1663_v30 }
0x1353   :  { %2419 = vmatprep.mubr.msk.f32.mxu0 %vm2748_vm4, %v2749_v26 }
0x1425   :  { %v2395_v35 = vpop.f32.mrb[14].mxu0 }
0x1426   :  { %v1750_v36 = vadd.f32 %v2395_v35, %v1671_v1  ;;  %v1744_v2 = vpop.f32.mrb[15].mxu0 }
0x1427   :  { %v1745_v16 = vadd.f32 %v1744_v2, %v1671_v1 }
0x1428   :  { %v1754_v15 = vmax.f32 %v1750_v36, 0.0 }
0x1429   :  { %v1753_v42 = vmax.f32 %v1745_v16, 0.0 }
0x142b   :  { %2412 = vmatprep.mubr.msk.f32.mxu1 %vm447_vm3, %v1753_v42 }
0x142c   :  { %2413 = vmatmul.mubr.msk.f32.vlgmr.msra.gmra.mrb[12].mxu1 %vm447_vm3, %v1754_v15 }
0x14ff   :  { %v2414_v34 = vpop.f32.mrb[12].mxu1 }
0x1500   :  { %v1845_v41 = vadd.f32 %v2414_v34, %v1766_v44  ;;  %v1839_v20 = vpop.f32.mrb[13].mxu1 }
0x1501   :  { %v1840_v38 = vadd.f32 %v1839_v20, %v1766_v44 }
0x1502   :  { %v1849_v47 = vadd.f32 %v1845_v41, %v1663_v30 }
0x1503   :  { %v1848_v32 = vadd.f32 %v1840_v38, %v1662_v27 }
0x1504   :  { %v1853_v19 = vsel %vm61_vm1, %v1849_v47, 0.0 }
0x1505   :  { %1854 = vadd.xlane.f32.xlu0 %v1853_v19  ;;  %v1850_v45 = vsel %vm61_vm1, %v1848_v32, 0.0 }
0x1506   :  { %1851 = vadd.xlane.f32.xlu1 %v1850_v45 }
0x1592   :  { %v1855_v48 = vpop.xlane.xlu0 %1854 }
0x1593   :  { %v1857_v50 = vmul.f32 0.03125, %v1855_v48  ;;  %v1852_v59 = vpop.xlane.xlu1 %1851 }
0x1594   :  { %v1856_v61 = vmul.f32 0.03125, %v1852_v59 }
0x1595   :  { %v1859_v4 = vsub.f32 %v1849_v47, %v1857_v50 }
0x1596   :  { %v1858_v49 = vsub.f32 %v1848_v32, %v1856_v61 }
0x1597   :  { %v1861_v51 = vmul.f32 %v1859_v4, %v1859_v4 }
0x1598   :  { %v1860_v24 = vmul.f32 %v1858_v49, %v1858_v49 }
0x1599   :  { %v1865_v52 = vsel %vm61_vm1, %v1861_v51, 0.0 }
0x159a   :  { %1866 = vadd.xlane.f32.xlu0 %v1865_v52  ;;  %v1862_v39 = vsel %vm61_vm1, %v1860_v24, 0.0 }
0x159b   :  { %1863 = vadd.xlane.f32.xlu1 %v1862_v39 }
0x1627   :  { %v1867_v53 = vpop.xlane.xlu0 %1866 }
0x1628   :  { %v1869_v22 = vmul.f32 0.03125, %v1867_v53  ;;  %v1864_v54 = vpop.xlane.xlu1 %1863 }
0x1629   :  { %v1868_v5 = vmul.f32 0.03125, %v1864_v54 }
0x162a   :  { %v1871_v3 = vadd.f32 1e-05, %v1869_v22 }
0x162b   :  { %v1870_v55 = vadd.f32 1e-05, %v1868_v5 }
0x162c   :  { %2686 = vrsqrt.f32 %v1871_v3 }
0x162d   :  { %2688 = vrsqrt.f32 %v1870_v55 }
0x1636   :  { %v2687_v8 = vpop.eup %2686 }
0x1637   :  { %v2689_v62 = vpop.eup %2688  ;;  %v1875_v46 = vmul.f32 %v2687_v8, %v1859_v4 }
0x1638   :  { %v1874_v0 = vmul.f32 %v2689_v62, %v1858_v49 }
0x1639   :  { %v1881_v43 = vmul.f32 %v1879_v56, %v1875_v46 }
0x163a   :  { %v1880_v14 = vmul.f32 %v1879_v56, %v1874_v0 }
0x163b   :  { %v1887_v23 = vadd.f32 %v1885_v10, %v1881_v43 }
0x163c   :  { %v1886_v57 = vadd.f32 %v1885_v10, %v1880_v14 }
0x163e   :  { %v2598_v63 = vpack.c.bf16 %v1887_v23, %v1886_v57 }
0x1640   :  { %2599 = vmatpush3.bf16.msra.mxu0 %v2598_v63 }
0x1641   :  { %2600 = vmatprep.subr.bf16.mxu0 %v2747_v37 }
0x1643   :  { %2420 = vmatmul.mubr.msk.f32.vlgmr.msra.gmra.mrb[16].mxu0 %vm59_vm0, %v1888_v6 }
0x1644   :  { %2602 = vmatpush3.bf16.msra.mxu0 %v2601_v7  ;;  %2430 = vmatprep.mubr.msk.f32.mxu0 %vm2748_vm4, %v2749_v26 }
0x1645   :  { %2603 = vmatprep.subr.bf16.mxu0 %v2747_v37 }
0x1648   :  { %2605 = vmatpush3.bf16.msra.mxu0 %v2604_v18 }
0x1716   :  { %v1958_v29 = vpop.f32.mrb[16].mxu0 }
0x1717   :  { %v2421_v40 = vpop.f32.mrb[17].mxu0  ;;  %2431 = vmatmul.mubr.msk.f32.vlgmr.msra.gmra.mrb[18].mxu0 %vm61_vm1, %v1958_v29 }
0x17ea   :  { %v2040_v12 = vpop.f32.mrb[18].mxu0 }
0x17eb   :  { %v2041_v13 = vadd.f32 %v2084_v11, %v2040_v12  ;;  %v2432_v17 = vpop.f32.mrb[19].mxu0 }
0x17ed   :  { %2044 = vst [vmem:[%s3123_s3] sm:$0xff] %v2041_v13 }
0x17ee   :  { %2049 = vsyncpa [#allocation3], 1 }
0x17ef   :  { %2050 = vsyncpa [#allocation5], 1 }

</bundles_post_ra>
